<compile_context>
chip_gen: v5e
topology: v5e:2x2
jax: 0.10.0
libtpu: 0.0.40
codegen_flags: <defaults>
</compile_context>

<pallas_src>
import functools

import jax
import jax.numpy as jnp
from jax.experimental import pallas as pl
from jax.experimental.pallas import tpu as pltpu


# ---------------------------------------------------------------------------
# Kernel 1: t2i cross-attention scores, one image tile x one caption tile per
# grid step.  Image tile is resident across the (inner) caption axis.
# ---------------------------------------------------------------------------
def _xattn_t2i_kernel(cap_ref, mask_ref, img_ref, out_ref, *,
                      raw_feature_norm, agg_func, lambda_softmax, lambda_lse,
                      eps):
    Cb, W, D = cap_ref.shape                 # caption tile (bf16), W % 8 == 0
    Nb, R, _ = img_ref.shape                 # image tile   (bf16)

    mask = mask_ref[...]                               # (Cb, W, 1) f32, 0/1
    cap = cap_ref[...] * mask.astype(cap_ref.dtype)    # zero padded words
    imgs = img_ref[...]                                 # (Nb, R, D)

    cap_flat = cap.reshape(Cb * W, D)
    imgs_flat = imgs.reshape(Nb * R, D)

    # --- attention logits: ONE flattened MXU matmul, M=Cb*W, K=D, N=Nb*R
    attn = jax.lax.dot_general(
        cap_flat, imgs_flat,
        dimension_numbers=(((1,), (1,)), ((), ())),
        preferred_element_type=jnp.float32)             # (Cb*W, Nb*R) f32
    attn = attn.reshape(Cb, W, Nb * R)                  # free: W % 8 == 0

    # --- raw_feature_norm over the word axis (== PyTorch l2norm(attn, dim=2))
    if raw_feature_norm == "clipped_l2norm":
        attn = jnp.where(attn > 0, attn, 0.1 * attn)    # LeakyReLU(0.1)
        norm = jnp.sqrt(jnp.sum(attn * attn, axis=1, keepdims=True)) + eps
        attn = attn / norm       # exact divide: error here is amplified by exp
    elif raw_feature_norm == "l2norm":
        norm = jnp.sqrt(jnp.sum(attn * attn, axis=1, keepdims=True)) + eps
        attn = attn / norm
    elif raw_feature_norm == "no_norm":
        pass
    else:
        # TODO(synk): 'softmax', 'l1norm', 'clipped_l1norm', 'clipped' variants.
        raise NotImplementedError(raw_feature_norm)

    # --- softmax over regions with temperature lambda_softmax.
    # No max-subtraction: after l2norm |attn| <= 1 so |logits| <= lambda_softmax.
    e = jnp.exp(attn * lambda_softmax)                  # lane-dense EUP exp
    # single relayout into the batched layout needed by the second matmul
    e = jnp.swapaxes(e.reshape(Cb * W, Nb, R), 0, 1)    # (Nb, Cb*W, R)
    inv_den = pl.reciprocal(jnp.sum(e, axis=-1, keepdims=True), approx=True)
    # approx reciprocal OK: the softmax scale cancels exactly in the cosine.
    attn_sm = (e * inv_den).astype(imgs.dtype)          # (Nb, Cb*W, R) bf16

    # --- weighted context: batched over images, contract regions
    wei = jnp.einsum("nmr,nrd->nmd", attn_sm, imgs,
                     preferred_element_type=jnp.float32)  # (Nb, Cb*W, D) f32

    # --- cosine similarity along D (caption words broadcast over images)
    capf = cap_flat.astype(jnp.float32)                 # (Cb*W, D)
    w12 = jnp.sum(wei * capf[None], axis=-1)            # (Nb, Cb*W)
    w2 = jnp.sqrt(jnp.sum(wei * wei, axis=-1))          # (Nb, Cb*W)
    w1 = jnp.sqrt(jnp.sum(capf * capf, axis=-1))[None]  # (1, Cb*W) VPU reduce
    denom = jnp.maximum(w1 * w2, eps)                   # clamp(min=eps)
    row_sim = w12 / denom                                # EXACT divide

    # --- aggregate over valid words only (per caption in the tile)
    row_sim = row_sim.reshape(Nb, Cb, W)                 # tiny relayout
    n_valid = jnp.sum(mask, axis=1).reshape(1, Cb, 1)    # (1, Cb, 1) f32 counts
    valid = (jax.lax.broadcasted_iota(jnp.int32, (1, Cb, W), 2)
             < n_valid.astype(jnp.int32))                 # (1, Cb, W)

    if agg_func == "LogSumExp":
        # TODO(synk): zero-length captions yield log(0) = -inf (same as PyTorch).
        t = jnp.where(valid, jnp.exp(row_sim * lambda_lse), 0.0)
        s = jnp.log(jnp.sum(t, axis=-1)) * (1.0 / lambda_lse)
    elif agg_func == "Mean":
        nv = jnp.maximum(n_valid[:, :, 0], 1.0)          # zero-length guard
        s = jnp.sum(jnp.where(valid, row_sim, 0.0), axis=-1) / nv
    elif agg_func == "Sum":
        s = jnp.sum(jnp.where(valid, row_sim, 0.0), axis=-1)
    elif agg_func == "Max":
        s = jnp.max(jnp.where(valid, row_sim, -1e30), axis=-1)
    else:
        raise NotImplementedError(agg_func)

    out_ref[...] = s[None, None].astype(out_ref.dtype)   # (1, 1, Nb, Cb)


def xattn_score_t2i(images, captions, cap_lens, *,
                    raw_feature_norm="clipped_l2norm", agg_func="LogSumExp",
                    lambda_softmax=9.0, lambda_lse=6.0, eps=1e-8,
                    compute_dtype=jnp.bfloat16,
                    img_block=None, cap_block=None, vmem_limit_bytes=None):
    """t2i cross-attention similarity matrix, shape (n_image, n_caption), f32.

    img_block / cap_block bound the per-step VMEM footprint; pick the largest
    tiles that fit (v7x: img_block ~16-32 and vmem_limit ~40 MiB at D~1024;
    v5e/v6e: img_block 64-128 and vmem_limit up to ~96 MiB).
    """
    n_image, n_region, d = images.shape
    n_caption, max_words, d2 = captions.shape
    assert d == d2, "image / caption feature dims must match"

    # Pad the word axis to a multiple of 8 so in-kernel sublane reshapes are
    # free; padded words are masked out and contribute nothing.
    Wp = ((max_words + 7) // 8) * 8
    caps = captions.astype(compute_dtype)       # bf16 inputs / f32 accumulate
    if Wp != max_words:
        caps = jnp.pad(caps, ((0, 0), (0, Wp - max_words), (0, 0)))
    imgs = images.astype(compute_dtype)

    # Per-word validity mask (also encodes the caption lengths for 'Mean').
    word_mask = (jnp.arange(Wp, dtype=jnp.int32)[None, :]
                 < cap_lens.astype(jnp.int32)[:, None]).astype(jnp.float32)
    word_mask = word_mask[:, :, None]            # (n_caption, Wp, 1)

    if img_block is None:
        img_block = n_image
    if cap_block is None:
        cap_block = n_caption
    assert n_image % img_block == 0 and n_caption % cap_block == 0
    n_img_tiles = n_image // img_block
    n_cap_tiles = n_caption // cap_block

    kernel = functools.partial(
        _xattn_t2i_kernel,
        raw_feature_norm=raw_feature_norm, agg_func=agg_func,
        lambda_softmax=float(lambda_softmax), lambda_lse=float(lambda_lse),
        eps=float(eps))

    out = pl.pallas_call(
        kernel,
        out_shape=jax.ShapeDtypeStruct(
            (n_img_tiles, n_cap_tiles, img_block, cap_block), jnp.float32),
        # image tiles OUTER (resident), caption tiles INNER (streamed)
        grid=(n_img_tiles, n_cap_tiles),
        in_specs=[
            pl.BlockSpec((cap_block, Wp, d), lambda j, i: (i, 0, 0)),
            pl.BlockSpec((cap_block, Wp, 1), lambda j, i: (i, 0, 0)),
            # depends only on the outer index -> DMA'd once per image tile
            pl.BlockSpec((img_block, n_region, d), lambda j, i: (j, 0, 0)),
        ],
        out_specs=pl.BlockSpec((1, 1, img_block, cap_block),
                               lambda j, i: (j, i, 0, 0)),
        compiler_params=pltpu.CompilerParams(
            # both axes are independent; megacore sharding left to the compiler
            dimension_semantics=("parallel", "parallel"),
            vmem_limit_bytes=vmem_limit_bytes),
    )(caps, word_mask, imgs)

    # (n_image, n_caption): rows = images, cols = captions (PyTorch layout).
    return out.transpose(0, 2, 1, 3).reshape(n_image, n_caption)


# ---------------------------------------------------------------------------
# Kernel 2: contrastive hinge loss over the (B, B) score matrix.
# ---------------------------------------------------------------------------
def _contrastive_loss_kernel(scores_ref, out_ref, *, margin, max_violation):
    s = scores_ref[...].astype(jnp.float32)                   # (B, B)
    B = s.shape[0]
    row = jax.lax.broadcasted_iota(jnp.int32, (B, B), 0)
    col = jax.lax.broadcasted_iota(jnp.int32, (B, B), 1)
    eye = row == col

    diag = jnp.where(eye, s, 0.0)
    d_col = jnp.sum(diag, axis=1, keepdims=True)              # (B, 1): s[i, i]
    d_row = jnp.sum(diag, axis=0, keepdims=True)              # (1, B): s[j, j]

    cost_s = jnp.maximum(margin + s - d_col, 0.0)             # caption retrieval
    cost_im = jnp.maximum(margin + s - d_row, 0.0)            # image retrieval
    cost_s = jnp.where(eye, 0.0, cost_s)
    cost_im = jnp.where(eye, 0.0, cost_im)

    if max_violation:
        cs = jnp.max(cost_s, axis=1, keepdims=True)           # (B, 1)
        ci = jnp.max(cost_im, axis=0, keepdims=True)          # (1, B)
    else:
        cs = jnp.sum(cost_s, axis=1, keepdims=True)
        ci = jnp.sum(cost_im, axis=0, keepdims=True)

    out_ref[...] = (jnp.sum(cs, axis=0, keepdims=True)
                    + jnp.sum(ci, axis=1, keepdims=True))     # (1, 1)


def contrastive_loss_from_scores(scores, *, margin=0.0, max_violation=False):
    kernel = functools.partial(_contrastive_loss_kernel,
                               margin=float(margin),
                               max_violation=bool(max_violation))
    loss = pl.pallas_call(
        kernel,
        out_shape=jax.ShapeDtypeStruct((1, 1), jnp.float32),
    )(scores.astype(jnp.float32))
    return loss[0, 0]


def contrastive_loss(im, s, s_l, *, margin=0.0, max_violation=False,
                     cross_attn="t2i", **xattn_kwargs):
    """Forward pass of ContrastiveLoss (only opt.cross_attn='t2i' implemented)."""
    if cross_attn == "t2i":
        scores = xattn_score_t2i(im, s, s_l, **xattn_kwargs)
    else:
        # TODO(synk): 'i2t' scoring path (xattn_score_i2t) not implemented.
        raise NotImplementedError(cross_attn)
    return contrastive_loss_from_scores(scores, margin=margin,
                                        max_violation=max_violation)


# ---------------------------------------------------------------------------
# Pure-JAX references (true per-caption slicing, exact divisions).
# bf16 matmul inputs / f32 accumulation is an intentional precision choice
# mirroring the kernel (the original PyTorch model runs in f32 throughout).
# ---------------------------------------------------------------------------
def _xattn_score_t2i_reference(images, captions, cap_lens, *, raw_feature_norm,
                               agg_func, lambda_softmax, lambda_lse, eps,
                               compute_dtype=jnp.bfloat16):
    imgs = images.astype(compute_dtype)
    caps = captions.astype(compute_dtype)
    cols = []
    for i in range(caps.shape[0]):
        n_word = int(cap_lens[i])
        cap = caps[i, :n_word, :]                              # (w, D)
        attn = jnp.einsum("wd,nrd->nwr", cap, imgs,
                          preferred_element_type=jnp.float32)  # (N, w, R)
        if raw_feature_norm in ("clipped_l2norm", "l2norm"):
            if raw_feature_norm == "clipped_l2norm":
                attn = jnp.where(attn > 0, attn, 0.1 * attn)
            attn = attn / (jnp.sqrt(jnp.sum(attn * attn, axis=1,
                                            keepdims=True)) + eps)
        e = jnp.exp(attn * lambda_softmax)
        attn_sm = e / jnp.sum(e, axis=-1, keepdims=True)
        wei = jnp.einsum("nwr,nrd->nwd", attn_sm.astype(imgs.dtype), imgs,
                         preferred_element_type=jnp.float32)
        capf = cap.astype(jnp.float32)
        w12 = jnp.sum(wei * capf[None], axis=-1)
        w1 = jnp.sqrt(jnp.sum(capf * capf, axis=-1))[None, :]
        w2 = jnp.sqrt(jnp.sum(wei * wei, axis=-1))
        row_sim = w12 / jnp.maximum(w1 * w2, eps)              # (N, w)
        if agg_func == "LogSumExp":
            col = jnp.log(jnp.sum(jnp.exp(row_sim * lambda_lse), -1)) / lambda_lse
        elif agg_func == "Mean":
            col = jnp.mean(row_sim, axis=-1)
        elif agg_func == "Sum":
            col = jnp.sum(row_sim, axis=-1)
        elif agg_func == "Max":
            col = jnp.max(row_sim, axis=-1)
        else:
            raise NotImplementedError(agg_func)
        cols.append(col)
    return jnp.stack(cols, axis=1)                             # (n_image, n_caption)


def _contrastive_loss_reference(scores, margin, max_violation):
    B = scores.shape[0]
    diag = jnp.diag(scores).reshape(B, 1)
    cost_s = jnp.maximum(margin + scores - diag, 0.0)
    cost_im = jnp.maximum(margin + scores - diag.T, 0.0)
    eye = jnp.eye(B, dtype=bool)
    cost_s = jnp.where(eye, 0.0, cost_s)
    cost_im = jnp.where(eye, 0.0, cost_im)
    if max_violation:
        return jnp.sum(jnp.max(cost_s, axis=1)) + jnp.sum(jnp.max(cost_im, axis=0))
    return jnp.sum(cost_s) + jnp.sum(cost_im)


if __name__ == "__main__":
    key = jax.random.PRNGKey(0)
    k_im, k_cap = jax.random.split(key)

    # small shapes: B images == B captions (square score matrix), 8 regions,
    # up to 8 words, feature dim 32; 4x4 tiles exercise the 2x2 grid and the
    # image-tile residency across the inner caption axis.
    B, R, W, D = 8, 8, 8, 32
    images = jax.random.normal(k_im, (B, R, D), dtype=jnp.float32)
    captions = jax.random.normal(k_cap, (B, W, D), dtype=jnp.float32)
    cap_lens = jnp.array([8, 5, 7, 3, 6, 8, 2, 4], dtype=jnp.int32)

    opt = dict(raw_feature_norm="clipped_l2norm", agg_func="LogSumExp",
               lambda_softmax=9.0, lambda_lse=6.0, eps=1e-8,
               compute_dtype=jnp.bfloat16)
    tiling = dict(img_block=4, cap_block=4)
    margin = 0.2

    # Pallas forward
    scores = xattn_score_t2i(images, captions, cap_lens, **opt, **tiling)
    loss_mv = contrastive_loss(images, captions, cap_lens, margin=margin,
                               max_violation=True, cross_attn="t2i",
                               **opt, **tiling)
    loss_sum = contrastive_loss(images, captions, cap_lens, margin=margin,
                                max_violation=False, cross_attn="t2i",
                                **opt, **tiling)
    scores, loss_mv, loss_sum = jax.block_until_ready((scores, loss_mv, loss_sum))

    # References (same bf16 inputs / f32 accumulation, exact divisions)
    scores_ref = _xattn_score_t2i_reference(images, captions, cap_lens, **opt)
    loss_ref_mv = _contrastive_loss_reference(scores_ref, margin, True)
    loss_ref_sum = _contrastive_loss_reference(scores_ref, margin, False)

    assert scores.shape == (B, B)
    assert jnp.allclose(scores, scores_ref, atol=1e-2, rtol=1e-2), \
        f"scores mismatch:\n{scores}\n{scores_ref}"
    assert jnp.allclose(loss_mv, loss_ref_mv, atol=3e-2, rtol=3e-2), \
        f"max-violation loss mismatch: {loss_mv} vs {loss_ref_mv}"
    assert jnp.allclose(loss_sum, loss_ref_sum, atol=3e-2, rtol=3e-2), \
        f"sum loss mismatch: {loss_sum} vs {loss_ref_sum}"

    print("KERNEL_OK")
</pallas_src>

<mosaic_0001>
module attributes {stable_mosaic.version = 11 : i64} {
  func.func @_xattn_t2i_kernel(%arg0: i32, %arg1: i32, %arg2: memref<4x8x32xbf16, #tpu.memory_space<vmem>>, %arg3: memref<4x8x1xf32, #tpu.memory_space<vmem>>, %arg4: memref<4x8x32xbf16, #tpu.memory_space<vmem>>, %arg5: memref<1x1x4x4xf32, #tpu.memory_space<vmem>>) attributes {dimension_semantics = [#tpu.dimension_semantics<parallel>, #tpu.dimension_semantics<parallel>], iteration_bounds = array<i64: 2, 2>, scalar_prefetch = 0 : i64, scratch_operands = 0 : i64, tpu.core_type = #tpu.core_type<tc>, window_params = [{transform_indices = @transform_0, window_bounds = array<i64: 4, 8, 32>}, {transform_indices = @transform_1, window_bounds = array<i64: 4, 8, 1>}, {transform_indices = @transform_2, window_bounds = array<i64: 4, 8, 32>}, {transform_indices = @transform_3, window_bounds = array<i64: 1, 1, 4, 4>}]} {
    %c0 = arith.constant 0 : index
    %c0_0 = arith.constant 0 : index
    %c0_1 = arith.constant 0 : index
    %0 = vector.load %arg3[%c0, %c0_0, %c0_1] : memref<4x8x1xf32, #tpu.memory_space<vmem>>, vector<4x8x1xf32>
    %c0_2 = arith.constant 0 : index
    %c0_3 = arith.constant 0 : index
    %c0_4 = arith.constant 0 : index
    %1 = vector.load %arg2[%c0_2, %c0_3, %c0_4] : memref<4x8x32xbf16, #tpu.memory_space<vmem>>, vector<4x8x32xbf16>
    %2 = arith.truncf %0 : vector<4x8x1xf32> to vector<4x8x1xbf16>
    %3 = vector.broadcast %2 : vector<4x8x1xbf16> to vector<4x8x32xbf16>
    %4 = arith.mulf %1, %3 : vector<4x8x32xbf16>
    %c0_5 = arith.constant 0 : index
    %c0_6 = arith.constant 0 : index
    %c0_7 = arith.constant 0 : index
    %5 = vector.load %arg4[%c0_5, %c0_6, %c0_7] : memref<4x8x32xbf16, #tpu.memory_space<vmem>>, vector<4x8x32xbf16>
    %6 = vector.shape_cast %4 : vector<4x8x32xbf16> to vector<32x32xbf16>
    %7 = vector.shape_cast %5 : vector<4x8x32xbf16> to vector<32x32xbf16>
    %cst = arith.constant dense<0.000000e+00> : vector<32x32xf32>
    %8 = tpu.matmul %6, %7, %cst {dimension_numbers = #tpu.dot_dimension_numbers<[1], [1], [0], [0], [0, 0, 1, 0], [], []>} : vector<32x32xbf16>, vector<32x32xbf16>, vector<32x32xf32> -> vector<32x32xf32>
    %9 = vector.shape_cast %8 : vector<32x32xf32> to vector<4x8x32xf32>
    %cst_8 = arith.constant 0.000000e+00 : f32
    %10 = vector.broadcast %cst_8 : f32 to vector<4x8x32xf32>
    %11 = arith.cmpf ogt, %9, %10 : vector<4x8x32xf32>
    %cst_9 = arith.constant 1.000000e-01 : f32
    %12 = vector.broadcast %cst_9 : f32 to vector<4x8x32xf32>
    %13 = arith.mulf %12, %9 : vector<4x8x32xf32>
    %14 = arith.select %11, %9, %13 : vector<4x8x32xi1>, vector<4x8x32xf32>
    %15 = arith.mulf %14, %14 : vector<4x8x32xf32>
    %cst_10 = arith.constant dense<0.000000e+00> : vector<4x32xf32>
    %16 = vector.multi_reduction <add>, %15, %cst_10 [1] : vector<4x8x32xf32> to vector<4x32xf32>
    %17 = vector.shape_cast %16 : vector<4x32xf32> to vector<4x1x32xf32>
    %18 = math.sqrt %17 : vector<4x1x32xf32>
    %cst_11 = arith.constant 9.99999993E-9 : f32
    %19 = vector.broadcast %cst_11 : f32 to vector<4x1x32xf32>
    %20 = arith.addf %18, %19 : vector<4x1x32xf32>
    %21 = vector.broadcast %20 : vector<4x1x32xf32> to vector<4x8x32xf32>
    %22 = arith.divf %14, %21 : vector<4x8x32xf32>
    %cst_12 = arith.constant 9.000000e+00 : f32
    %23 = vector.broadcast %cst_12 : f32 to vector<4x8x32xf32>
    %24 = arith.mulf %22, %23 : vector<4x8x32xf32>
    %25 = math.exp %24 : vector<4x8x32xf32>
    %26 = vector.shape_cast %25 : vector<4x8x32xf32> to vector<32x4x8xf32>
    %27 = tpu.transpose %26, [1, 0, 2] : vector<32x4x8xf32> -> vector<4x32x8xf32>
    %cst_13 = arith.constant dense<0.000000e+00> : vector<4x32xf32>
    %28 = vector.multi_reduction <add>, %27, %cst_13 [2] : vector<4x32x8xf32> to vector<4x32xf32>
    %29 = vector.shape_cast %28 : vector<4x32xf32> to vector<4x32x1xf32>
    %30 = tpu.reciprocal %29 {approx = true} : vector<4x32x1xf32> -> vector<4x32x1xf32>
    %31 = vector.broadcast %30 : vector<4x32x1xf32> to vector<4x32x8xf32>
    %32 = arith.mulf %27, %31 : vector<4x32x8xf32>
    %33 = arith.truncf %32 : vector<4x32x8xf32> to vector<4x32x8xbf16>
    "tpu.trace_start"() <{level = 10 : i32, message = "nmr,nrd->nmd"}> : () -> ()
    %cst_14 = arith.constant dense<0.000000e+00> : vector<4x32x32xf32>
    %34 = tpu.matmul %33, %5, %cst_14 {dimension_numbers = #tpu.dot_dimension_numbers<[2], [1], [1], [2], [0, 0, 0, 1, 1, 2], [0], [0]>} : vector<4x32x8xbf16>, vector<4x8x32xbf16>, vector<4x32x32xf32> -> vector<4x32x32xf32>
    "tpu.trace_stop"() : () -> ()
    %35 = arith.extf %6 : vector<32x32xbf16> to vector<32x32xf32>
    %36 = vector.shape_cast %35 : vector<32x32xf32> to vector<1x32x32xf32>
    %37 = vector.broadcast %36 : vector<1x32x32xf32> to vector<4x32x32xf32>
    %38 = arith.mulf %34, %37 : vector<4x32x32xf32>
    %cst_15 = arith.constant dense<0.000000e+00> : vector<4x32xf32>
    %39 = vector.multi_reduction <add>, %38, %cst_15 [2] : vector<4x32x32xf32> to vector<4x32xf32>
    %40 = arith.mulf %34, %34 : vector<4x32x32xf32>
    %cst_16 = arith.constant dense<0.000000e+00> : vector<4x32xf32>
    %41 = vector.multi_reduction <add>, %40, %cst_16 [2] : vector<4x32x32xf32> to vector<4x32xf32>
    %42 = math.sqrt %41 : vector<4x32xf32>
    %43 = arith.mulf %35, %35 : vector<32x32xf32>
    %cst_17 = arith.constant dense<0.000000e+00> : vector<32xf32>
    %44 = vector.multi_reduction <add>, %43, %cst_17 [1] : vector<32x32xf32> to vector<32xf32>
    %45 = math.sqrt %44 : vector<32xf32>
    %46 = vector.shape_cast %45 : vector<32xf32> to vector<1x32xf32>
    %47 = vector.broadcast %46 : vector<1x32xf32> to vector<4x32xf32>
    %48 = arith.mulf %47, %42 : vector<4x32xf32>
    %cst_18 = arith.constant 9.99999993E-9 : f32
    %49 = vector.broadcast %cst_18 : f32 to vector<4x32xf32>
    %50 = arith.maximumf %48, %49 : vector<4x32xf32>
    %51 = arith.divf %39, %50 : vector<4x32xf32>
    %52 = vector.shape_cast %51 : vector<4x32xf32> to vector<4x4x8xf32>
    %cst_19 = arith.constant dense<0.000000e+00> : vector<4x1xf32>
    %53 = vector.multi_reduction <add>, %0, %cst_19 [1] : vector<4x8x1xf32> to vector<4x1xf32>
    %54 = vector.shape_cast %53 : vector<4x1xf32> to vector<1x4x1xf32>
    %55 = tpu.iota {dimensions = array<i32: 2>} : vector<1x4x8xi32>
    %56 = arith.fptosi %54 : vector<1x4x1xf32> to vector<1x4x1xi32>
    %57 = vector.broadcast %56 : vector<1x4x1xi32> to vector<1x4x8xi32>
    %58 = arith.cmpi slt, %55, %57 : vector<1x4x8xi32>
    %cst_20 = arith.constant 6.000000e+00 : f32
    %59 = vector.broadcast %cst_20 : f32 to vector<4x4x8xf32>
    %60 = arith.mulf %52, %59 : vector<4x4x8xf32>
    %61 = math.exp %60 : vector<4x4x8xf32>
    %cst_21 = arith.constant 0.000000e+00 : f32
    %62 = vector.shape_cast %58 : vector<1x4x8xi1> to vector<1x4x8xi1>
    %63 = vector.broadcast %62 : vector<1x4x8xi1> to vector<4x4x8xi1>
    %64 = vector.broadcast %cst_21 : f32 to vector<4x4x8xf32>
    %65 = arith.select %63, %61, %64 : vector<4x4x8xi1>, vector<4x4x8xf32>
    %cst_22 = arith.constant dense<0.000000e+00> : vector<4x4xf32>
    %66 = vector.multi_reduction <add>, %65, %cst_22 [2] : vector<4x4x8xf32> to vector<4x4xf32>
    %67 = math.log %66 : vector<4x4xf32>
    %cst_23 = arith.constant 0.166666672 : f32
    %68 = vector.broadcast %cst_23 : f32 to vector<4x4xf32>
    %69 = arith.mulf %67, %68 : vector<4x4xf32>
    %70 = vector.shape_cast %69 : vector<4x4xf32> to vector<1x1x4x4xf32>
    %c0_24 = arith.constant 0 : index
    %c0_25 = arith.constant 0 : index
    %c0_26 = arith.constant 0 : index
    %c0_27 = arith.constant 0 : index
    %71 = vector.load %arg5[%c0_24, %c0_25, %c0_26, %c0_27] : memref<1x1x4x4xf32, #tpu.memory_space<vmem>>, vector<1x1x4x4xf32>
    tpu.vector_store %arg5[%c0_24, %c0_25, %c0_26, %c0_27], %70 {strides = array<i32>} : memref<1x1x4x4xf32, #tpu.memory_space<vmem>>, vector<1x1x4x4xf32>,
    return
  }
  func.func @transform_0(%arg0: i32, %arg1: i32) -> (i32, i32, i32) {
    %c0_i32 = arith.constant 0 : i32
    %c0_i32_0 = arith.constant 0 : i32
    %c0_i32_1 = arith.constant 0 : i32
    return %arg1, %c0_i32, %c0_i32_0 : i32, i32, i32
  }
  func.func @transform_1(%arg0: i32, %arg1: i32) -> (i32, i32, i32) {
    %c0_i32 = arith.constant 0 : i32
    %c0_i32_0 = arith.constant 0 : i32
    %c0_i32_1 = arith.constant 0 : i32
    return %arg1, %c0_i32, %c0_i32_0 : i32, i32, i32
  }
  func.func @transform_2(%arg0: i32, %arg1: i32) -> (i32, i32, i32) {
    %c0_i32 = arith.constant 0 : i32
    %c0_i32_0 = arith.constant 0 : i32
    %c0_i32_1 = arith.constant 0 : i32
    return %arg0, %c0_i32, %c0_i32_0 : i32, i32, i32
  }
  func.func @transform_3(%arg0: i32, %arg1: i32) -> (i32, i32, i32, i32) {
    %c0_i32 = arith.constant 0 : i32
    %c0_i32_0 = arith.constant 0 : i32
    %c0_i32_1 = arith.constant 0 : i32
    return %arg0, %arg1, %c0_i32, %c0_i32_0 : i32, i32, i32, i32
  }
}

</mosaic_0001>

<bundles_post_ra>
// kernel: tpu_custom_call.1
= control target key start
LH: loop header
LB: loop body
LE: loop exit
PB: predicated region body
PF: predicated region fallthrough
CT: control target
= control target key end

     0   :  { %8 = vsyncpa [#allocation3], 0  ;;  %s4016_s0 = inlined_call_operand.vmem [shape: bf16[8,8,32], index: 0, kind: input, shape index: {}]   ;;  %s4017_s1 = inlined_call_operand.vmem [shape: f32[8,8,1], index: 1, kind: input, shape index: {}]   ;;  %s4018_s2 = inlined_call_operand.vmem [shape: bf16[8,8,32], index: 2, kind: input, shape index: {}]   ;;  %s4019_s3 = inlined_call_operand.hbm [shape: f32[2,2,4,4], index: 3, kind: output, shape index: {}]  }
   0x1   :  { %10 = vsyncpa [#allocation3 + $0x1], 0  ;;  %s2677_s12 = smov 0   ;;  %s2679_s13 = smov 0  }
   0x2   :  { %s2681_s14 = smov 0   ;;  %s2683_s15 = smov 0  }
   0x3   :  { %s2685_s16 = smov 0   ;;  %s2687_s17 = smov 0  }
   0x4   :  { %s2689_s18 = smov 0   ;;  %s2691_s19 = smov 0  }
   0x5 LB: > { %s2258_s20 = sadd.s32 4294967295, %s2648_s19   ;;  %s2259_s21 = sadd.s32 4294967294, %s2648_s19   ;;  %s2648_s19 = sphi %s2691_s19, %s16_s19   ;;  %s2644_s18 = sphi %s2689_s18, %s4050_s18   ;;  %s2640_s17 = sphi %s2687_s17, %s4049_s17   ;;  %s2636_s16 = sphi %s2685_s16, %s4048_s16   ;;  %s2632_s15 = sphi %s2683_s15, %s4047_s15   ;;  %s2628_s14 = sphi %s2681_s14, %s4046_s14   ;;  %s2624_s13 = sphi %s2679_s13, %s4045_s13   ;;  %s2620_s12 = sphi %s2677_s12, %s4044_s12  }
   0x6   : > { %s25_s22 = sadd.s32 1, %s2640_s17  ;;  %s28_s23 = sadd.s32 1, %s2644_s18 }
   0x7   : > { %p26_p0 = scmp.ge.s32.totalorder %s25_s22, 2  ;;  %p125_p1 = scmp.ne.s32.totalorder %s2628_s14, %s2624_s13 }
   0x8   : > { %p126_p2 = scmp.eq.s32.totalorder %s2258_s20, 3  ;;  %p131_p5 = scmp.ne.s32.totalorder %s2624_s13, %s2620_s12 }
   0x9   : > { %s4052_s22 = smov (%p26_p0, %s25_s22), 0  ;;  %s4054_s23 = smov (!%p26_p0, %s28_s23), %s2644_s18 }
   0xa   : > { %s111_s24 = ssub.s32 %s2640_s17, %s4052_s22  ;;  %p2728_p3 = por %p126_p2, %p125_p1 }
   0xb   : > { %p30_p4 = scmp.ge.s32.totalorder %s4054_s23, 2  ;;  %p132_p6 = scmp.eq.s32.totalorder %s2259_s21, 3 }
   0xc   : > { %p2262_p7 = scmp.ge.s32.totalorder %s2648_s19, 1  ;;  %p177_p9 = scmp.lt.s32.totalorder %s2648_s19, 5 }
   0xd   : > { %s4056_s23 = smov (%p30_p4, %s4054_s23), 0  ;;  %p2737_p8 = por %p132_p6, %p131_p5 }
   0xe   : > { %s110_s27 = ssub.s32 %s2644_s18, %s4056_s23  ;;  %s115_s28 = sadd.s32 1, %s2628_s14 }
   0xf   : > { %s112_s29 = sor.u32 %s111_s24, %s110_s27  ;;  %p178_p10 = pnand %p2262_p7, %p177_p9 }
  0x10   : > { %p113_p11 = scmp.eq.s32.totalorder %s112_s29, 0  ;;  %s2264_s4 = sshll.u32 (!%p178_p10), %s2632_s15, 2 }
  0x11   : > { %181 = sbr.rel (%p178_p10) target bundleno = 1379 (0x563), region = 32  ;;  %p212_p12 = scmp.lt.s32.totalorder (!%p178_p10), %s2264_s4, 7 }
  0x12   : > { %s2746_s30 = scalar_select %p113_p11, %s2628_s14, %s115_s28  }
  0x13   : > { %s2268_s9 = sshll.u32 (!%p178_p10), %s2636_s16, 2  ;;  %s2654_s6 = smov (!%p178_p10), 104  }
  0x14   : > { %p224_p13 = scmp.lt.s32.totalorder (!%p178_p10), %s2268_s9, 7  ;;  %s2289_s7 = sshll.u32 (!%p178_p10), %s2636_s16, 1 }
  0x16   : > { %v2650_v0 = vmov 0   ;;  %s4058_s4 = smov (!%p212_p12, %s2264_s4), 7  ;;  %s4060_s9 = smov (!%p224_p13, %s2268_s9), 7  ;;  %vm318_vm0 = vcmask 261120   ;;  %v2651_v13 = vmov 839922192  }
  0x17   : > { %2403 = vset.pattern.permute.xlu0 %v2650_v0  ;;  %2404 = vset.pattern.permute.xlu1 %v2650_v0  ;;  %s2267_s5 = sshll.u32 %s4058_s4, 3  ;;  %s2269_s10 = sshll.u32 %s4060_s9, 2  ;;  %v248_v14 = vunpack.c.l.s4 %v2651_v13 }
  0x18   : > { %2405 = vset.pattern.permute.xlu2 %v2650_v0  ;;  %s2755_s8 = scalar_lea.vmem %s4017_s1, %s2267_s5  ;;  %s2765_s21 = scalar_lea.vmem %s4018_s2, %s2269_s10 }
  0x19   : > { %v230_v1 = vld [vmem:[%s2755_s8] sm:$0xff]  ;;  %v232_v2 = vld [vmem:[%s2755_s8 + $0x10] sm:$0xff]  ;;  %v231_v5 = vld [vmem:[%s2755_s8 + $0x8] sm:$0xff]  ;;  %s2265_s24 = sshll.u32 %s4058_s4, 2  ;;  %v249_v15 = vunpack.c.0.s8 %v248_v14  ;;  %s2652_s4 = smov 120  }
  0x1a   : > { %v238_v3 = vpack.c.bf16 %v230_v1, %v230_v1  ;;  %v240_v4 = vpack.c.bf16 %v232_v2, %v232_v2  ;;  %v233_v6 = vld [vmem:[%s2755_s8 + $0x18] sm:$0xff]  ;;  %v239_v7 = vpack.c.bf16 %v231_v5, %v231_v5  ;;  %v2294_v9 = vld [vmem:[%s2765_s21 + $0x8] sm:$0xff]  ;;  %v2293_v11 = vld [vmem:[%s2765_s21] sm:$0xff]  ;;  %s215_s29 = scalar_lea.vmem %s4016_s0, %s2265_s24  ;;  %s2653_s5 = smov 112  }
  0x1b   : > { %v241_v8 = vpack.c.bf16 %v233_v6, %v233_v6  ;;  %v329_v10 = vsel %vm318_vm0, %v2294_v9, 0  ;;  %v326_v12 = vsel %vm318_vm0, %v2293_v11, 0  ;;  %v2296_v18 = vld [vmem:[%s215_s29] sm:$0xff]   ;;  %v2303_v30 = vld [vmem:[%s215_s29 + $0x8] sm:$0xff]   ;;  %s2155_s9 = sadd.s32 %s2632_s15, %s2289_s7  ;;  %s2574_s7 = scalar_lea.hbm %s4019_s3, 16 }
  0x1c   : > { %244 = vperm.xlu0 %2403, %v238_v3   ;;  %262 = vperm.xlu1 %2404, %v240_v4   ;;  %v2297_v20 = vunpack.c.l.bf16 %v2296_v18  ;;  %v2298_v24 = vunpack.c.h.bf16 %v2296_v18  ;;  %v2301_v36 = vunpack.c.l.bf16 %v2303_v30  ;;  %v2302_v38 = vunpack.c.h.bf16 %v2303_v30  ;;  %s2290_s11 = sshll.u32 %s2155_s9, 2 }
  0x1d   : > { %337 = vmatpush.bf16.xpose.msra.mxu0 %v329_v10 }
  0x24   : > { %253 = vperm.xlu0 %2403, %v239_v7   ;;  %271 = vperm.xlu1 %2404, %v241_v8  }
  0x25   : > { %338 = vmatpush.bf16.xpose.msra.mxu0 %v326_v12 }
  0x8e   : > { %v245_v16 = vpop.permute.xlu0 %244  ;;  %v263_v19 = vpop.permute.xlu1 %262 }
  0x8f   : > { %v250_v17 = vperm.slane %v245_v16, %v249_v15  ;;  %v268_v31 = vperm.slane %v263_v19, %v249_v15 }
  0x91   : > { %v282_v21 = vunpack.c.l.bf16 %v250_v17  ;;  %v284_v37 = vunpack.c.l.bf16 %v268_v31 }
  0x93   : > { %v286_v23 = vmul.f32 %v2297_v20, %v282_v21  ;;  %v288_v41 = vmul.f32 %v2301_v36, %v284_v37 }
  0x95   : > { %v2775_v28 = vpack.c.bf16 %v286_v23, %v286_v23  ;;  %v2782_v43 = vpack.c.bf16 %v288_v41, %v288_v41 }
  0x96   : > { %v254_v22 = vpop.permute.xlu0 %253  ;;  %v272_v27 = vpop.permute.xlu1 %271 }
  0x97   : > { %v259_v25 = vperm.slane %v254_v22, %v249_v15  ;;  %v277_v33 = vperm.slane %v272_v27, %v249_v15  ;;  %v302_v34 = vunpack.c.l.b16 %v2775_v28  ;;  %v304_v45 = vunpack.c.l.b16 %v2782_v43 }
  0x99   : > { %v283_v26 = vunpack.c.l.bf16 %v259_v25  ;;  %v285_v39 = vunpack.c.l.bf16 %v277_v33 }
  0x9b   : > { %v287_v29 = vmul.f32 %v2298_v24, %v283_v26  ;;  %v289_v42 = vmul.f32 %v2302_v38, %v285_v39 }
  0x9d   : > { %v2777_v32 = vpack.c.bf16 %v287_v29, %v287_v29  ;;  %v2784_v44 = vpack.c.bf16 %v289_v42, %v289_v42 }
  0x9f   : > { %v303_v35 = vunpack.c.l.b16 %v2777_v32  ;;  %v305_v46 = vunpack.c.l.b16 %v2784_v44 }
  0xa1   : > { %v306_v40 = vpack.c.b16 %v303_v35, %v302_v34  ;;  %v307_v47 = vpack.c.b16 %v305_v46, %v304_v45 }
  0xa3   : > { %2278 = vmatmul.msk.bf16.vlgmr.msra.gmra.mxu0 %vm318_vm0, %v306_v40 }
  0xb3   : > { %2279 = vmatmul.msk.bf16.gmra.mxu0 %vm318_vm0, %v307_v47 }
 0x120   : > { %v340_v48 = vpop.f32.mrf.mxu0 }
 0x121   : > { %vm350_vm1 = vcmp.gt.f32.partialorder %v340_v48, 0.0  ;;  %v354_v49 = vmul.f32 0.1, %v340_v48 }
 0x123   : > { %v2789_v50 = vsel %vm350_vm1, %v340_v48, %v354_v49 }
 0x124   : > { %v362_v51 = vmul.f32 %v2789_v50, %v2789_v50 }
 0x126   : > { %v366_v52 = vsel %vm318_vm0, %v362_v51, 0.0 }
 0x127   : > { %v367_v53 = vrot.slane %v366_v52, 4 }
 0x128   : > { %v342_v54 = vpop.f32.mrf.mxu0 }
 0x129   : > { %v368_v55 = vadd.f32 %v367_v53, %v366_v52  ;;  %vm351_vm2 = vcmp.gt.f32.partialorder %v342_v54, 0.0  ;;  %v355_v56 = vmul.f32 0.1, %v342_v54 }
 0x12b   : > { %v369_v57 = vrot.slane %v368_v55, 2  ;;  %v2794_v58 = vsel %vm351_vm2, %v342_v54, %v355_v56 }
 0x12c   : > { %v363_v59 = vmul.f32 %v2794_v58, %v2794_v58 }
 0x12d   : > { %v370_v60 = vadd.f32 %v369_v57, %v368_v55 }
 0x12e   : > { %v373_v61 = vsel %vm318_vm0, %v363_v59, 0.0 }
 0x12f   : > { %v371_v62 = vrot.slane %v370_v60, 1  ;;  %v374_v63 = vrot.slane %v373_v61, 4 }
 0x130   : > { %v345_v0 = vpop.f32.mrf.mxu0 }
 0x131   : > { %v372_v1 = vadd.f32 %v371_v62, %v370_v60  ;;  %v375_v2 = vadd.f32 %v374_v63, %v373_v61  ;;  %vm352_vm3 = vcmp.gt.f32.partialorder %v345_v0, 0.0  ;;  %v356_v3 = vmul.f32 0.1, %v345_v0 }
 0x133   : > { %2406 = vrsqrt.f32 %v372_v1  ;;  %v376_v4 = vrot.slane %v375_v2, 2  ;;  %v2799_v5 = vsel %vm352_vm3, %v345_v0, %v356_v3  ;;  %vm401_vm5 = vcmp.eq.f32.partialorder %v372_v1, inf }
 0x134   : > { %v364_v6 = vmul.f32 %v2799_v5, %v2799_v5  ;;  %v404_v36 = vand.u32 2147483648, %v372_v1  ;;  %vm403_vm6 = vcmp.eq.f32.partialorder %v372_v1, 0.0 }
 0x135   : > { %v377_v7 = vadd.f32 %v376_v4, %v375_v2 }
 0x136   : > { %v380_v8 = vsel %vm318_vm0, %v364_v6, 0.0 }
 0x137   : > { %v378_v9 = vrot.slane %v377_v7, 1  ;;  %v381_v10 = vrot.slane %v380_v8, 4 }
 0x138   : > { %v347_v11 = vpop.f32.mrf.mxu0 }
 0x139   : > { %v2407_v12 = vpop.eup %2406  ;;  %vm353_vm4 = vcmp.gt.f32.partialorder %v347_v11, 0.0  ;;  %v357_v13 = vmul.f32 0.1, %v347_v11  ;;  %v379_v15 = vadd.f32 %v378_v9, %v377_v7  ;;  %v382_v16 = vadd.f32 %v381_v10, %v380_v8 }
 0x13a   : > { %v395_v14 = vmul.f32 %v2407_v12, %v372_v1 }
 0x13b   : > { %v2804_v17 = vsel %vm353_vm4, %v347_v11, %v357_v13  ;;  %2408 = vrsqrt.f32 %v379_v15  ;;  %v383_v19 = vrot.slane %v382_v16, 2  ;;  %vm413_vm7 = vcmp.eq.f32.partialorder %v379_v15, inf }
 0x13c   : > { %v396_v18 = vmul.f32 %v2407_v12, %v395_v14  ;;  %v365_v20 = vmul.f32 %v2804_v17, %v2804_v17  ;;  %v416_v56 = vand.u32 2147483648, %v379_v15  ;;  %vm415_vm8 = vcmp.eq.f32.partialorder %v379_v15, 0.0 }
 0x13d   : > { %v384_v22 = vadd.f32 %v383_v19, %v382_v16 }
 0x13e   : > { %v397_v21 = vmul.f32 0.5, %v396_v18  ;;  %v387_v23 = vsel %vm318_vm0, %v365_v20, 0.0 }
 0x13f   : > { %v388_v25 = vrot.slane %v387_v23, 4  ;;  %v385_v26 = vrot.slane %v384_v22, 1 }
 0x140   : > { %v398_v24 = vsub.f32 1.5, %v397_v21 }
 0x141   : > { %v2409_v27 = vpop.eup %2408  ;;  %v389_v30 = vadd.f32 %v388_v25, %v387_v23  ;;  %v386_v33 = vadd.f32 %v385_v26, %v384_v22 }
 0x142   : > { %v399_v29 = vmul.f32 %v2407_v12, %v398_v24  ;;  %v407_v31 = vmul.f32 %v2409_v27, %v379_v15 }
 0x143   : > { %v390_v35 = vrot.slane %v389_v30, 2  ;;  %2410 = vrsqrt.f32 %v386_v33  ;;  %vm425_vm11 = vcmp.eq.f32.partialorder %v386_v33, inf  ;;  %v428_v10 = vand.u32 2147483648, %v386_v33 }
 0x144   : > { %v400_v34 = vmul.f32 %v399_v29, %v372_v1  ;;  %v408_v37 = vmul.f32 %v2409_v27, %v407_v31  ;;  %vm427_vm13 = vcmp.eq.f32.partialorder %v386_v33, 0.0 }
 0x145   : > { %v391_v39 = vadd.f32 %v390_v35, %v389_v30 }
 0x146   : > { %v402_v38 = vsel %vm401_vm5, %v372_v1, %v400_v34  ;;  %v409_v41 = vmul.f32 0.5, %v408_v37 }
 0x147   : > { %v405_v40 = vsel %vm403_vm6, %v404_v36, %v402_v38  ;;  %v392_v45 = vrot.slane %v391_v39, 1 }
 0x148   : > { %v442_v42 = vadd.f32 1e-08, %v405_v40  ;;  %v410_v46 = vsub.f32 1.5, %v409_v41 }
 0x149   : > { %v2411_v47 = vpop.eup %2410  ;;  %v393_v49 = vadd.f32 %v392_v45, %v391_v39 }
 0x14a   : > { %2412 = vrcp.f32 %v442_v42  ;;  %v411_v48 = vmul.f32 %v2409_v27, %v410_v46  ;;  %v419_v51 = vmul.f32 %v2411_v47, %v386_v33  ;;  %v457_v0 = vand.u32 2147483648, %v442_v42 }
 0x14b   : > { %2414 = vrsqrt.f32 %v393_v49  ;;  %v455_v4 = vand.u32 2147483647, %v442_v42  ;;  %vm451_vm10 = vweird.f32 %v442_v42  ;;  %vm437_vm15 = vcmp.eq.f32.partialorder %v393_v49, inf }
 0x14c   : > { %v412_v52 = vmul.f32 %v411_v48, %v379_v15  ;;  %v420_v53 = vmul.f32 %v2411_v47, %v419_v51  ;;  %v458_v11 = vor.u32 1.1754944e-38, %v457_v0  ;;  %v440_v26 = vand.u32 2147483648, %v393_v49 }
 0x14d   : > { %vm456_vm14 = vcmp.eq.f32.partialorder %v455_v4, 8.507059e+37  ;;  %vm439_vm1 = vcmp.eq.f32.partialorder %v393_v49, 0.0 }
 0x14e   : > { %v414_v54 = vsel %vm413_vm7, %v379_v15, %v412_v52  ;;  %v421_v57 = vmul.f32 0.5, %v420_v53 }
 0x14f   : > { %v417_v60 = vsel %vm415_vm8, %v416_v56, %v414_v54 }
 0x150   : > { %v2413_v55 = vpop.eup %2412  ;;  %v422_v61 = vsub.f32 1.5, %v421_v57  ;;  %v2809_v6 = vadd.f32 1e-08, %v417_v60 }
 0x151   : > { %v447_v59 = vmul.f32 %v2413_v55, %v442_v42  ;;  %v2415_v62 = vpop.eup %2414  ;;  %vm452_vm9 = vweird.f32 %v2413_v55 }
 0x152   : > { %v423_v1 = vmul.f32 %v2411_v47, %v422_v61  ;;  %v431_v2 = vmul.f32 %v2415_v62, %v393_v49  ;;  %vm453_vm12 = vmor %vm451_vm10, %vm452_vm9  ;;  %2416 = vrcp.f32 %v2809_v6  ;;  %vm466_vm7 = vweird.f32 %v2809_v6 }
 0x153   : > { %v448_v63 = vsub.f32 1.0, %v447_v59  ;;  %v472_v53 = vand.u32 2147483648, %v2809_v6  ;;  %v470_v56 = vand.u32 2147483647, %v2809_v6 }
 0x154   : > { %v424_v7 = vmul.f32 %v423_v1, %v386_v33  ;;  %v432_v8 = vmul.f32 %v2415_v62, %v431_v2 }
 0x155   : > { %v449_v3 = vmul.f32 %v2413_v55, %v448_v63 }
 0x156   : > { %v426_v12 = vsel %vm425_vm11, %v386_v33, %v424_v7  ;;  %v433_v13 = vmul.f32 0.5, %v432_v8 }
 0x157   : > { %v450_v9 = vadd.f32 %v2413_v55, %v449_v3  ;;  %v429_v15 = vsel %vm427_vm13, %v428_v10, %v426_v12 }
 0x158   : > { %v444_v18 = vadd.f32 1e-08, %v429_v15  ;;  %v434_v20 = vsub.f32 1.5, %v433_v13  ;;  %v2417_v23 = vpop.eup %2416  ;;  %v2655_v13 = vmov 1983009808  }
 0x159   : > { %v454_v14 = vsel %vm453_vm12, %v2413_v55, %v450_v9  ;;  %v462_v30 = vmul.f32 %v2417_v23, %v2809_v6  ;;  %vm467_vm6 = vweird.f32 %v2417_v23  ;;  %vm471_vm12 = vcmp.eq.f32.partialorder %v470_v56, 8.507059e+37 }
 0x15a   : > { %v459_v16 = vsel %vm456_vm14, %v458_v11, %v454_v14  ;;  %2418 = vrcp.f32 %v444_v18  ;;  %v435_v22 = vmul.f32 %v2415_v62, %v434_v20  ;;  %v487_v36 = vand.u32 2147483648, %v444_v18  ;;  %vm468_vm9 = vmor %vm466_vm7, %vm467_vm6 }
 0x15b   : > { %v460_v19 = vmul.f32 %v459_v16, %v2789_v50  ;;  %v463_v50 = vsub.f32 1.0, %v462_v30  ;;  %v485_v39 = vand.u32 2147483647, %v444_v18  ;;  %vm481_vm3 = vweird.f32 %v444_v18 }
 0x15c   : > { %v436_v25 = vmul.f32 %v435_v22, %v393_v49  ;;  %v488_v42 = vor.u32 1.1754944e-38, %v487_v36  ;;  %v564_v14 = vunpack.c.l.s4 %v2655_v13  ;;  %vm559_vm14 = vcmask 1047556  }
 0x15d   : > { %v506_v21 = vmul.f32 9.0, %v460_v19  ;;  %v464_v41 = vmul.f32 %v2417_v23, %v463_v50  ;;  %vm486_vm5 = vcmp.eq.f32.partialorder %v485_v39, 8.507059e+37  ;;  %v2656_v22 = vmov 1934713408  }
 0x15e   : > { %v438_v27 = vsel %vm437_vm15, %v393_v49, %v436_v25  ;;  %v2841_v19 = vunpack.c.0.s8 %v564_v14  ;;  %vm999_vm15 = vcmask 64512  }
 0x15f   : > { %v510_v24 = vmul.f32 1.442695, %v506_v21  ;;  %v441_v31 = vsel %vm439_vm1, %v440_v26, %v438_v27  ;;  %v465_v51 = vadd.f32 %v2417_v23, %v464_v41  ;;  %vm1112_vm1 = vcmask 1043456  }
 0x160   : > { %v2419_v29 = vpop.eup %2418  ;;  %v445_v34 = vadd.f32 1e-08, %v441_v31 }
 0x161   : > { %2420 = vpow2.f32 %v510_v24  ;;  %v477_v33 = vmul.f32 %v2419_v29, %v444_v18  ;;  %vm482_vm2 = vweird.f32 %v2419_v29  ;;  %v469_v61 = vsel %vm468_vm9, %v2417_v23, %v465_v51 }
 0x162   : > { %2422 = vrcp.f32 %v445_v34  ;;  %vm483_vm4 = vmor %vm481_vm3, %vm482_vm2  ;;  %v502_v55 = vand.u32 2147483648, %v445_v34  ;;  %v500_v59 = vand.u32 2147483647, %v445_v34  ;;  %vm496_vm10 = vweird.f32 %v445_v34 }
 0x163   : > { %v478_v35 = vsub.f32 1.0, %v477_v33  ;;  %v588_v23 = vunpack.c.l.s4 %v2656_v22 }
 0x164   : > { %v503_v63 = vor.u32 1.1754944e-38, %v502_v55  ;;  %vm501_vm13 = vcmp.eq.f32.partialorder %v500_v59, 8.507059e+37 }
 0x165   : > { %v479_v38 = vmul.f32 %v2419_v29, %v478_v35  ;;  %v2847_v30 = vunpack.c.0.s8 %v588_v23 }
 0x167   : > { %v2814_v37 = vpop.eup %2420  ;;  %v480_v40 = vadd.f32 %v2419_v29, %v479_v38 }
 0x168   : > { %522 = vrot.lane.b32.xlu1 %v2814_v37, %s2652_s4  ;;  %v2423_v45 = vpop.eup %2422 }
 0x169   : > { %v484_v46 = vsel %vm483_vm4, %v2419_v29, %v480_v40  ;;  %v492_v48 = vmul.f32 %v2423_v45, %v445_v34  ;;  %vm497_vm8 = vweird.f32 %v2423_v45 }
 0x16a   : > { %v489_v47 = vsel %vm486_vm5, %v488_v42, %v484_v46  ;;  %vm498_vm11 = vmor %vm496_vm10, %vm497_vm8  ;;  %vm2038_vm5 = vcmask 7168  }
 0x16b   : > { %v490_v49 = vmul.f32 %v489_v47, %v2799_v5  ;;  %v493_v52 = vsub.f32 1.0, %v492_v48  ;;  %v473_v5 = vor.u32 1.1754944e-38, %v472_v53  ;;  %v561_v48 = vrot.slane %v2814_v37, 4 }
 0x16d   : > { %v508_v54 = vmul.f32 9.0, %v490_v49  ;;  %v494_v57 = vmul.f32 %v2423_v45, %v493_v52  ;;  %v474_v1 = vsel %vm471_vm12, %v473_v5, %v469_v61 }
 0x16e   : > { %v475_v4 = vmul.f32 %v474_v1, %v2794_v58 }
 0x16f   : > { %v514_v60 = vmul.f32 1.442695, %v508_v54  ;;  %v495_v62 = vadd.f32 %v2423_v45, %v494_v57 }
 0x170   : > { %v507_v9 = vmul.f32 9.0, %v475_v4 }
 0x171   : > { %2424 = vpow2.f32 %v514_v60  ;;  %v499_v0 = vsel %vm498_vm11, %v2423_v45, %v495_v62 }
 0x172   : > { %v504_v2 = vsel %vm501_vm13, %v503_v63, %v499_v0  ;;  %v512_v10 = vmul.f32 1.442695, %v507_v9 }
 0x173   : > { %v505_v3 = vmul.f32 %v504_v2, %v2804_v17 }
 0x175   : > { %v509_v6 = vmul.f32 9.0, %v505_v3 }
 0x177   : > { %v2425_v7 = vpop.eup %2424  ;;  %v516_v8 = vmul.f32 1.442695, %v509_v6 }
 0x178   : > { %538 = vrot.lane.b32.xlu0 %v2425_v7, %s2653_s5  ;;  %526 = vrot.lane.b32.xlu2 %v2425_v7, %s2652_s4  ;;  %v673_v25 = vrot.slane %v2425_v7, 4 }
 0x179   : > { %2426 = vpow2.f32 %v516_v8 }
 0x17a   : > { %2428 = vpow2.f32 %v512_v10 }
 0x17f   : > { %v2825_v11 = vpop.eup %2426 }
 0x180   : > { %534 = vrot.lane.b32.xlu0 %v2814_v37, %s2653_s5  ;;  %550 = vrot.lane.b32.xlu2 %v2425_v7, %s2654_s6  ;;  %v2829_v58 = vpop.eup %2428  ;;  %v729_v59 = vrot.slane %v2825_v11, 4 }
 0x181   : > { %540 = vrot.lane.b32.xlu1 %v2825_v11, %s2653_s5  ;;  %v617_v53 = vrot.slane %v2829_v58, 4 }
 0x188   : > { %552 = vrot.lane.b32.xlu0 %v2825_v11, %s2654_s6  ;;  %528 = vrot.lane.b32.xlu2 %v2825_v11, %s2652_s4 }
 0x189   : > { %536 = vrot.lane.b32.xlu1 %v2829_v58, %s2653_s5 }
 0x190   : > { %548 = vrot.lane.b32.xlu0 %v2829_v58, %s2654_s6  ;;  %524 = vrot.lane.b32.xlu2 %v2829_v58, %s2652_s4 }
 0x198   : > { %546 = vrot.lane.b32.xlu2 %v2814_v37, %s2654_s6 }
 0x1d2   : > { %v527_v17 = vpop.permute.xlu2 %526 }
 0x1d3   : > { %v685_v16 = vrot.slane %v527_v17, 4 }
 0x1da   : > { %v551_v12 = vpop.permute.xlu2 %550  ;;  %v523_v29 = vpop.permute.xlu1 %522 }
 0x1db   : > { %v683_v18 = vrot.slane %v551_v12, 4  ;;  %v686_v20 = vsel %vm559_vm14, %v551_v12, %v685_v16  ;;  %v573_v54 = vrot.slane %v523_v29, 4 }
 0x1dc   : > { %v694_v24 = vperm.slane %v686_v20, %v2841_v19 }
 0x1dd   : > { %v684_v21 = vsel %vm559_vm14, %v683_v18, %v527_v17 }
 0x1de   : > { %v690_v26 = vperm.slane %v684_v21, %v2841_v19  ;;  %v707_v35 = vrot.slane %v694_v24, 4 }
 0x1e0   : > { %v695_v38 = vrot.slane %v690_v26, 4 }
 0x1e2   : > { %v2839_v15 = vpop.permute.xlu2 %528 }
 0x1e3   : > { %v741_v55 = vrot.slane %v2839_v15, 4 }
 0x1ea   : > { %v539_v27 = vpop.permute.xlu0 %538  ;;  %v2850_v34 = vpop.permute.xlu2 %524 }
 0x1eb   : > { %v671_v31 = vrot.slane %v539_v27, 4  ;;  %v674_v33 = vsel %vm559_vm14, %v539_v27, %v673_v25  ;;  %v629_v5 = vrot.slane %v2850_v34, 4 }
 0x1ec   : > { %v682_v50 = vperm.slane %v674_v33, %v2841_v19 }
 0x1ed   : > { %v672_v36 = vsel %vm559_vm14, %v671_v31, %v2425_v7 }
 0x1ee   : > { %v678_v39 = vperm.slane %v672_v36, %v2841_v19  ;;  %v708_v40 = vsel %vm559_vm14, %v707_v35, %v682_v50  ;;  %v709_v41 = vrot.slane %v682_v50, 4 }
 0x1ef   : > { %v714_v42 = vperm.slane %v708_v40, %v2847_v30 }
 0x1f0   : > { %v696_v45 = vsel %vm559_vm14, %v695_v38, %v678_v39  ;;  %v697_v46 = vrot.slane %v678_v39, 4  ;;  %v710_v47 = vsel %vm559_vm14, %v694_v24, %v709_v41 }
 0x1f1   : > { %v702_v49 = vperm.slane %v696_v45, %v2847_v30  ;;  %v718_v51 = vperm.slane %v710_v47, %v2847_v30  ;;  %v723_v52 = vrot.slane %v714_v42, 4 }
 0x1f2   : > { %v698_v56 = vsel %vm559_vm14, %v690_v26, %v697_v46  ;;  %v535_v57 = vpop.permute.xlu0 %534  ;;  %v547_v9 = vpop.permute.xlu2 %546 }
 0x1f3   : > { %v706_v60 = vperm.slane %v698_v56, %v2847_v30  ;;  %v719_v61 = vrot.slane %v702_v49, 4  ;;  %v725_v62 = vrot.slane %v718_v51, 4  ;;  %v541_v63 = vpop.permute.xlu1 %540  ;;  %v558_v0 = vrot.slane %v535_v57, 4 }
 0x1f4   : > { %v562_v1 = vsel %vm559_vm14, %v535_v57, %v561_v48  ;;  %v727_v2 = vrot.slane %v541_v63, 4  ;;  %v730_v3 = vsel %vm559_vm14, %v541_v63, %v729_v59  ;;  %v724_v6 = vsel %vm559_vm14, 0.0, %v723_v52 }
 0x1f5   : > { %v721_v4 = vrot.slane %v706_v60, 4  ;;  %v726_v7 = vsel %vm559_vm14, 0.0, %v725_v62  ;;  %v570_v8 = vperm.slane %v562_v1, %v2841_v19  ;;  %v560_v17 = vsel %vm559_vm14, %v558_v0, %v2814_v37 }
 0x1f6   : > { %v907_v10 = vrot.slane %v726_v7, 4  ;;  %v728_v12 = vsel %vm559_vm14, %v727_v2, %v2825_v11  ;;  %v738_v13 = vperm.slane %v730_v3, %v2841_v19  ;;  %v2880_v16 = vsel %vm559_vm14, %v725_v62, %v714_v42 }
 0x1f7   : > { %v722_v14 = vsel %vm559_vm14, 0.0, %v721_v4  ;;  %v566_v18 = vperm.slane %v560_v17, %v2841_v19  ;;  %v734_v20 = vperm.slane %v728_v12, %v2841_v19  ;;  %v597_v23 = vrot.slane %v570_v8, 4 }
 0x1f8   : > { %v896_v21 = vrot.slane %v722_v14, 4  ;;  %v2885_v22 = vsel %vm559_vm14, %v907_v10, %v724_v6  ;;  %v571_v37 = vrot.slane %v547_v9, 4  ;;  %v765_v11 = vrot.slane %v738_v13, 4 }
 0x1f9   : > { %v585_v24 = vrot.slane %v566_v18, 4  ;;  %v753_v25 = vrot.slane %v734_v20, 4  ;;  %v574_v26 = vsel %vm559_vm14, %v547_v9, %v573_v54  ;;  %v720_v35 = vsel %vm559_vm14, 0.0, %v719_v61 }
 0x1fa   : > { %v572_v27 = vsel %vm559_vm14, %v571_v37, %v523_v29  ;;  %v582_v31 = vperm.slane %v574_v26, %v2841_v19  ;;  %v553_v33 = vpop.permute.xlu0 %552  ;;  %v891_v50 = vsel %vm559_vm14, %v721_v4, %v702_v49  ;;  %v897_v41 = vsel %vm559_vm14, %v896_v21, %v720_v35 }
 0x1fb   : > { %v578_v36 = vperm.slane %v572_v27, %v2841_v19  ;;  %v739_v38 = vrot.slane %v553_v33, 4  ;;  %v742_v39 = vsel %vm559_vm14, %v553_v33, %v741_v55  ;;  %v537_v40 = vpop.permute.xlu1 %536  ;;  %v2898_v46 = vperm.slane %v891_v50, %v2841_v19 }
 0x1fc   : > { %v595_v42 = vrot.slane %v582_v31, 4  ;;  %v598_v45 = vsel %vm559_vm14, %v582_v31, %v597_v23  ;;  %v750_v29 = vperm.slane %v742_v39, %v2841_v19  ;;  %v615_v56 = vrot.slane %v537_v40, 4 }
 0x1fd   : > { %v583_v47 = vrot.slane %v578_v36, 4  ;;  %v586_v48 = vsel %vm559_vm14, %v578_v36, %v585_v24  ;;  %v606_v49 = vperm.slane %v598_v45, %v2847_v30  ;;  %v740_v51 = vsel %vm559_vm14, %v739_v38, %v2839_v15 }
 0x1fe   : > { %v594_v52 = vperm.slane %v586_v48, %v2847_v30  ;;  %v596_v54 = vsel %vm559_vm14, %v595_v42, %v570_v8  ;;  %v746_v55 = vperm.slane %v740_v51, %v2841_v19  ;;  %v763_v61 = vrot.slane %v750_v29, 4 }
 0x1ff   : > { %v584_v57 = vsel %vm559_vm14, %v583_v47, %v566_v18  ;;  %v602_v59 = vperm.slane %v596_v54, %v2847_v30  ;;  %v613_v60 = vrot.slane %v606_v49, 4  ;;  %v766_v4 = vsel %vm559_vm14, %v750_v29, %v765_v11 }
 0x200   : > { %v2910_v62 = vperm.slane %v584_v57, %v2847_v30  ;;  %v2912_v63 = vrot.slane %v594_v52, 4  ;;  %v751_v0 = vrot.slane %v746_v55, 4  ;;  %v754_v15 = vsel %vm559_vm14, %v746_v55, %v753_v25 }
 0x201   : > { %v611_v1 = vrot.slane %v602_v59, 4  ;;  %v614_v2 = vsel %vm559_vm14, 0.0, %v613_v60  ;;  %v762_v3 = vperm.slane %v754_v15, %v2847_v30  ;;  %v2923_v7 = vsel %vm559_vm14, %v613_v60, %v602_v59 }
 0x202   : > { %v2920_v6 = vsel %vm559_vm14, 0.0, %v2912_v63  ;;  %v799_v8 = vrot.slane %v614_v2, 4  ;;  %v752_v9 = vsel %vm559_vm14, %v751_v0, %v734_v20  ;;  %v549_v10 = vpop.permute.xlu0 %548  ;;  %v607_v17 = vrot.slane %v2910_v62, 4 }
 0x203   : > { %v612_v12 = vsel %vm559_vm14, 0.0, %v611_v1  ;;  %v2929_v14 = vperm.slane %v752_v9, %v2847_v30  ;;  %v764_v18 = vsel %vm559_vm14, %v763_v61, %v738_v13  ;;  %v788_v21 = vrot.slane %v2920_v6, 4 }
 0x204   : > { %v770_v23 = vperm.slane %v764_v18, %v2847_v30  ;;  %v774_v37 = vperm.slane %v766_v4, %v2847_v30  ;;  %v2935_v24 = vrot.slane %v762_v3, 4  ;;  %v800_v20 = vsel %vm559_vm14, %v799_v8, %v612_v12 }
 0x205   : > { %v616_v25 = vsel %vm559_vm14, %v615_v56, %v2829_v58  ;;  %v618_v11 = vsel %vm559_vm14, %v537_v40, %v617_v53  ;;  %v627_v26 = vrot.slane %v549_v10, 4  ;;  %v775_v35 = vrot.slane %v2929_v14, 4 }
 0x206   : > { %v778_v13 = vsel %vm559_vm14, 0.0, %v2935_v24  ;;  %v779_v27 = vrot.slane %v770_v23, 4  ;;  %v781_v31 = vrot.slane %v774_v37, 4  ;;  %v622_v33 = vperm.slane %v616_v25, %v2841_v19 }
 0x207   : > { %v626_v50 = vperm.slane %v618_v11, %v2841_v19  ;;  %v628_v36 = vsel %vm559_vm14, %v627_v26, %v2850_v34  ;;  %v630_v58 = vsel %vm559_vm14, %v549_v10, %v629_v5  ;;  %v950_v39 = vrot.slane %v778_v13, 4 }
 0x208   : > { %v780_v53 = vsel %vm559_vm14, 0.0, %v779_v27  ;;  %v782_v38 = vsel %vm559_vm14, 0.0, %v781_v31  ;;  %v956_v40 = vsel %vm559_vm14, %v781_v31, %v770_v23  ;;  %v641_v45 = vrot.slane %v622_v33, 4 }
 0x209   : > { %v961_v42 = vrot.slane %v782_v38, 4  ;;  %v634_v29 = vperm.slane %v628_v36, %v2841_v19  ;;  %v638_v47 = vperm.slane %v630_v58, %v2841_v19  ;;  %v653_v48 = vrot.slane %v626_v50, 4 }
 0x20a   : > { %v2959_v49 = vperm.slane %v897_v41, %v2841_v19  ;;  %v2963_v34 = vperm.slane %v2880_v16, %v2841_v19  ;;  %v2967_v5 = vperm.slane %v2885_v22, %v2841_v19  ;;  %v608_v61 = vsel %vm559_vm14, 0.0, %v607_v17 }
 0x20b   : > { %v962_v51 = vsel %vm559_vm14, %v961_v42, %v780_v53  ;;  %v639_v52 = vrot.slane %v634_v29, 4  ;;  %v642_v54 = vsel %vm559_vm14, %v634_v29, %v641_v45  ;;  %v651_v55 = vrot.slane %v638_v47, 4 }
 0x20c   : > { %v650_v56 = vperm.slane %v642_v54, %v2847_v30  ;;  %v654_v57 = vsel %vm559_vm14, %v638_v47, %v653_v48  ;;  %v913_v41 = vrot.slane %v2959_v49, 4  ;;  %v925_v59 = vrot.slane %v2967_v5, 4 }
 0x20d   : > { %v640_v16 = vsel %vm559_vm14, %v639_v52, %v622_v33  ;;  %v652_v22 = vsel %vm559_vm14, %v651_v55, %v626_v50  ;;  %v662_v60 = vperm.slane %v654_v57, %v2847_v30  ;;  %v783_v8 = vsel %vm559_vm14, %v2912_v63, %v2910_v62 }
 0x20e   : > { %v646_v0 = vperm.slane %v640_v16, %v2847_v30  ;;  %v658_v15 = vperm.slane %v652_v22, %v2847_v30  ;;  %v665_v1 = vrot.slane %v650_v56, 4  ;;  %v914_v2 = vsel %vm559_vm14, %v913_v41, %v2898_v46 }
 0x20f   : > { %v669_v3 = vrot.slane %v662_v60, 4  ;;  %v2984_v4 = vperm.slane %v914_v2, %v2847_v30  ;;  %v926_v6 = vsel %vm559_vm14, %v925_v59, %v2963_v34  ;;  %v787_v12 = vperm.slane %v783_v8, %v2841_v19 }
 0x210   : > { %v666_v9 = vsel %vm559_vm14, 0.0, %v665_v1  ;;  %v667_v10 = vrot.slane %v658_v15, 4  ;;  %v2993_v17 = vperm.slane %v926_v6, %v2847_v30  ;;  %v789_v25 = vsel %vm559_vm14, %v788_v21, %v608_v61 }
 0x211   : > { %v670_v18 = vsel %vm559_vm14, 0.0, %v669_v3  ;;  %v842_v23 = vrot.slane %v666_v9, 4  ;;  %v848_v37 = vsel %vm559_vm14, %v669_v3, %v658_v15  ;;  %v793_v13 = vperm.slane %v789_v25, %v2841_v19 }
 0x212   : > { %v668_v11 = vsel %vm559_vm14, 0.0, %v667_v10  ;;  %v3001_v26 = vperm.slane %v848_v37, %v2841_v19  ;;  %v853_v62 = vrot.slane %v670_v18, 4  ;;  %v937_v63 = vrot.slane %v2993_v17, 4 }
 0x213   : > { %v798_v27 = vperm.slane %v2923_v7, %v2841_v19  ;;  %v804_v31 = vperm.slane %v800_v20, %v2841_v19  ;;  %v776_v33 = vsel %vm559_vm14, 0.0, %v775_v35  ;;  %v945_v50 = vsel %vm559_vm14, %v2935_v24, %v2929_v14 }
 0x214   : > { %v3011_v21 = vsel %vm559_vm14, %v937_v63, %v2984_v4  ;;  %v951_v36 = vsel %vm559_vm14, %v950_v39, %v776_v33  ;;  %v3018_v58 = vperm.slane %v956_v40, %v2841_v19  ;;  %v805_v53 = vrot.slane %v793_v13, 4 }
 0x215   : > { %v1006_v7 = vsel %vm999_vm15, %v3011_v21, 0.0  ;;  %v817_v20 = vrot.slane %v804_v31, 4  ;;  %v3023_v35 = vperm.slane %v945_v50, %v2841_v19  ;;  %v3026_v38 = vperm.slane %v951_v36, %v2841_v19 }
 0x216   : > { %1007 = vadd.xlane.f32.xlu1 %v1006_v7  ;;  %v3029_v42 = vperm.slane %v962_v51, %v2841_v19  ;;  %v807_v14 = vrot.slane %v787_v12, 4  ;;  %v819_v24 = vrot.slane %v798_v27, 4  ;;  %v806_v39 = vsel %vm559_vm14, %v805_v53, %v787_v12 }
 0x217   : > { %v818_v40 = vsel %vm559_vm14, %v817_v20, %v798_v27  ;;  %v663_v45 = vrot.slane %v646_v0, 4  ;;  %v837_v29 = vsel %vm559_vm14, %v665_v1, %v646_v0  ;;  %v812_v47 = vperm.slane %v806_v39, %v2847_v30 }
 0x218   : > { %v824_v48 = vperm.slane %v818_v40, %v2847_v30  ;;  %v967_v52 = vrot.slane %v3026_v38, 4  ;;  %v979_v54 = vrot.slane %v3029_v42, 4  ;;  %v808_v51 = vsel %vm559_vm14, %v793_v13, %v807_v14 }
 0x219   : > { %v820_v55 = vsel %vm559_vm14, %v804_v31, %v819_v24  ;;  %v664_v56 = vsel %vm559_vm14, 0.0, %v663_v45  ;;  %v841_v57 = vperm.slane %v837_v29, %v2841_v19  ;;  %v831_v59 = vrot.slane %v812_v47, 4 }
 0x21a   : > { %v829_v41 = vrot.slane %v824_v48, 4  ;;  %v968_v16 = vsel %vm559_vm14, %v967_v52, %v3023_v35  ;;  %v980_v22 = vsel %vm559_vm14, %v979_v54, %v3018_v58  ;;  %v3053_v0 = vperm.slane %v808_v51, %v2847_v30 }
 0x21b   : > { %v3047_v60 = vperm.slane %v968_v16, %v2847_v30  ;;  %v3050_v61 = vperm.slane %v980_v22, %v2847_v30  ;;  %v3056_v15 = vperm.slane %v820_v55, %v2847_v30  ;;  %v3062_v2 = vsel %vm559_vm14, %v824_v48, %v831_v59 }
 0x21c   : > { %v3059_v1 = vsel %vm559_vm14, %v829_v41, %v812_v47  ;;  %v843_v3 = vsel %vm559_vm14, %v842_v23, %v664_v56  ;;  %v854_v6 = vsel %vm559_vm14, %v853_v62, %v668_v11  ;;  %v1012_v9 = vsel %vm999_vm15, %v3062_v2, 0.0 }
 0x21d   : > { %v1000_v8 = vsel %vm999_vm15, %v3059_v1, 0.0  ;;  %v991_v10 = vrot.slane %v3050_v61, 4  ;;  %v833_v12 = vrot.slane %v3056_v15, 4  ;;  %v847_v18 = vperm.slane %v843_v3, %v2841_v19 }
 0x21e   : > { %1001 = vadd.xlane.f32.xlu0 %v1000_v8  ;;  %1013 = vadd.xlane.f32.xlu1 %v1012_v9  ;;  %v858_v37 = vperm.slane %v854_v6, %v2841_v19  ;;  %v861_v25 = vrot.slane %v841_v57, 4  ;;  %v873_v23 = vrot.slane %v3001_v26, 4  ;;  %v927_v14 = vrot.slane %v2963_v34, 4 }
 0x21f   : > { %v3077_v11 = vsel %vm559_vm14, %v991_v10, %v3047_v60  ;;  %v859_v33 = vrot.slane %v847_v18, 4  ;;  %v3087_v36 = vsel %vm559_vm14, %v833_v12, %v3053_v0  ;;  %v915_v34 = vrot.slane %v2898_v46, 4 }
 0x220   : > { %v1009_v62 = vsel %vm999_vm15, %v3077_v11, 0.0  ;;  %v862_v63 = vsel %vm559_vm14, %v847_v18, %v861_v25  ;;  %v874_v13 = vsel %vm559_vm14, %v858_v37, %v873_v23  ;;  %v871_v50 = vrot.slane %v858_v37, 4 }
 0x221   : > { %1010 = vadd.xlane.f32.xlu2 %v1009_v62  ;;  %v870_v27 = vperm.slane %v862_v63, %v2847_v30  ;;  %v882_v31 = vperm.slane %v874_v13, %v2847_v30  ;;  %v860_v53 = vsel %vm559_vm14, %v859_v33, %v841_v57  ;;  %v1024_v40 = vsel %vm999_vm15, %v3087_v36, 0.0 }
 0x222   : > { %v872_v20 = vsel %vm559_vm14, %v871_v50, %v3001_v26  ;;  %v866_v24 = vperm.slane %v860_v53, %v2847_v30  ;;  %v939_v26 = vrot.slane %v2984_v4, 4  ;;  %v928_v52 = vsel %vm559_vm14, %v2967_v5, %v927_v14 }
 0x223   : > { %v887_v7 = vrot.slane %v882_v31, 4  ;;  %v878_v39 = vperm.slane %v872_v20, %v2847_v30  ;;  %v889_v48 = vrot.slane %v870_v27, 4  ;;  %v981_v54 = vrot.slane %v3018_v58, 4 }
 0x224   : > { %v969_v55 = vrot.slane %v3023_v35, 4  ;;  %v885_v46 = vrot.slane %v866_v24, 4  ;;  %v936_v5 = vperm.slane %v928_v52, %v2847_v30  ;;  %v3121_v58 = vsel %vm559_vm14, %v2993_v17, %v939_v26 }
 0x225   : > { %v3098_v45 = vsel %vm559_vm14, %v887_v7, %v870_v27  ;;  %v883_v47 = vrot.slane %v878_v39, 4  ;;  %v982_v57 = vsel %vm559_vm14, %v3029_v42, %v981_v54  ;;  %v3116_v4 = vsel %vm559_vm14, %v882_v31, %v889_v48  ;;  %v296_v48 = vld [vmem:[%s2765_s21 + $0x8] sm:$0xf] }
 0x226   : > { %1025 = vadd.xlane.f32.xlu0 %v1024_v40  ;;  %v1027_v29 = vsel %vm999_vm15, %v3098_v45, 0.0  ;;  %v916_v35 = vsel %vm559_vm14, %v2959_v49, %v915_v34  ;;  %v990_v41 = vperm.slane %v982_v57, %v2847_v30  ;;  %v970_v59 = vsel %vm559_vm14, %v3026_v38, %v969_v55  ;;  %v295_v57 = vld [vmem:[%s2765_s21 + $0x4] sm:$0xf] }
 0x227   : > { %1028 = vadd.xlane.f32.xlu1 %v1027_v29  ;;  %v3108_v51 = vsel %vm559_vm14, %v883_v47, %v866_v24  ;;  %v1039_v42 = vsel %vm999_vm15, %v3116_v4, 0.0  ;;  %v1018_v16 = vsel %vm999_vm15, %v3121_v58, 0.0  ;;  %v3133_v22 = vsel %vm559_vm14, %v878_v39, %v885_v46  ;;  %v294_v29 = vld [vmem:[%s2765_s21] sm:$0xf] }
 0x228   : > { %v1003_v56 = vsel %vm999_vm15, %v3108_v51, 0.0  ;;  %v924_v17 = vperm.slane %v916_v35, %v2847_v30  ;;  %v941_v3 = vrot.slane %v936_v5, 4  ;;  %v978_v49 = vperm.slane %v970_v59, %v2847_v30 }
 0x229   : > { %1004 = vadd.xlane.f32.xlu2 %v1003_v56  ;;  %v995_v6 = vrot.slane %v990_v41, 4  ;;  %v1015_v38 = vsel %vm999_vm15, %v3133_v22, 0.0  ;;  %v835_v9 = vrot.slane %v3053_v0, 4  ;;  %v3149_v18 = vunpack.c.l.bf16 %v2784_v44 }
 0x22a   : > { %v3140_v8 = vsel %vm559_vm14, %v941_v3, %v924_v17  ;;  %v997_v23 = vrot.slane %v978_v49, 4  ;;  %v993_v63 = vrot.slane %v3047_v60, 4  ;;  %v3166_v13 = vunpack.c.l.bf16 %v2782_v43 }
 0x22b   : > { %v3144_v10 = vsel %vm559_vm14, %v995_v6, %v978_v49  ;;  %v1030_v12 = vsel %vm999_vm15, %v3140_v8, 0.0  ;;  %v3155_v25 = vsel %vm559_vm14, %v3056_v15, %v835_v9  ;;  %v1576_v44 = vmul.f32 %v3149_v18, %v3149_v18 }
 0x22c   : > { %v1033_v37 = vsel %vm999_vm15, %v3144_v10, 0.0  ;;  %v1036_v0 = vsel %vm999_vm15, %v3155_v25, 0.0  ;;  %v3160_v62 = vsel %vm559_vm14, %v990_v41, %v997_v23  ;;  %v3171_v27 = vunpack.c.l.bf16 %v2775_v28 }
 0x22d   : > { %v1045_v15 = vsel %vm999_vm15, %v3160_v62, 0.0  ;;  %v1586_v31 = vsel %vm318_vm0, %v1576_v44, 0.0  ;;  %v3176_v33 = vsel %vm559_vm14, %v3050_v61, %v993_v63  ;;  %v1575_v43 = vmul.f32 %v3166_v13, %v3166_v13 }
 0x22e   : > { %1040 = vadd.xlane.f32.xlu0 %v1039_v42  ;;  %v1021_v60 = vsel %vm999_vm15, %v3176_v33, 0.0  ;;  %v1573_v28 = vmul.f32 %v3171_v27, %v3171_v27  ;;  %v943_v50 = vrot.slane %v924_v17, 4  ;;  %v3190_v20 = vunpack.c.l.bf16 %v2777_v32 }
 0x22f   : > { %1019 = vadd.xlane.f32.xlu1 %v1018_v16  ;;  %v1583_v7 = vsel %vm318_vm0, %v1575_v43, 0.0  ;;  %v1114_v47 = vsel %vm1112_vm1, %v294_v29, 0  ;;  %v1190_v34 = vsel %vm1112_vm1, %v296_v48, 0 }
 0x230   : > { %v1577_v53 = vsel %vm318_vm0, %v1573_v28, 0.0  ;;  %v3187_v61 = vsel %vm559_vm14, %v936_v5, %v943_v50  ;;  %v1574_v24 = vmul.f32 %v3190_v20, %v3190_v20  ;;  %2304 = vmatpush.bf16.msra.mxu2 %v1114_v47  ;;  %1123 = vmatpush.bf16.msra.mxu1 %v1114_v47  ;;  %v1152_v5 = vsel %vm1112_vm1, %v295_v57, 0 }
 0x231   : > { %1016 = vadd.xlane.f32.xlu2 %v1015_v38  ;;  %v1042_v14 = vsel %vm999_vm15, %v3187_v61, 0.0  ;;  %1199 = vmatpush.bf16.msra.mxu3 %v1190_v34 }
 0x232   : > { %v1580_v39 = vsel %vm318_vm0, %v1574_v24, 0.0 }
 0x234   : > { %1161 = vmatpush.bf16.msrb.mxu2 %v1152_v5 }
 0x236   : > { %1031 = vadd.xlane.f32.xlu0 %v1030_v12 }
 0x237   : > { %1034 = vadd.xlane.f32.xlu1 %v1033_v37 }
 0x239   : > { %1037 = vadd.xlane.f32.xlu2 %v1036_v0 }
 0x23e   : > { %1046 = vadd.xlane.f32.xlu0 %v1045_v15 }
 0x23f   : > { %1587 = vadd.xlane.f32.xlu1 %v1586_v31 }
 0x241   : > { %1022 = vadd.xlane.f32.xlu2 %v1021_v60 }
 0x246   : > { %1584 = vadd.xlane.f32.xlu0 %v1583_v7 }
 0x247   : > { %1578 = vadd.xlane.f32.xlu1 %v1577_v53 }
 0x249   : > { %1043 = vadd.xlane.f32.xlu2 %v1042_v14 }
 0x251   : > { %1581 = vadd.xlane.f32.xlu2 %v1580_v39 }
 0x289   : > { %v1008_v40 = vpop.xlane.xlu1 %1007 }
 0x28a   : > { %2430 = vrcp.f32 %v1008_v40 }
 0x290   : > { %v2431_v54 = vpop.eup %2430 }
 0x291   : > { %v1002_v32 = vpop.xlane.xlu0 %1001  ;;  %v1014_v26 = vpop.xlane.xlu1 %1013  ;;  %v1066_v55 = vmul.f32 %v2431_v54, %v3011_v21 }
 0x293   : > { %v1082_v59 = vpack.c.bf16 %v1066_v55, %v1066_v55 }
 0x294   : > { %v1011_v52 = vpop.xlane.xlu2 %1010 }
 0x295   : > { %2432 = vrcp.f32 %v1011_v52  ;;  %v1102_v49 = vunpack.c.l.b16 %v1082_v59 }
 0x296   : > { %2434 = vrcp.f32 %v1002_v32  ;;  %v297_v32 = vld [vmem:[%s2765_s21 + $0xc] sm:$0xf]  ;;  %s2157_s21 = scalar_lea.hbm %s4019_s3, %s2290_s11 }
 0x297   : > { %v1228_v34 = vsel %vm1112_vm1, %v297_v32, 0  ;;  %s2161_s27 = sshll.u32 %s2157_s21, 4  ;;  %s2162_s27 = int_to_ptr.hbm [resolvable:$true] %s2161_s27 }
 0x298   : > { %1237 = vmatpush.bf16.msrb.mxu1 %v1228_v34  ;;  %s2568_s29 = sshra.s32 %s2162_s27, 4  ;;  %s2569_s29 = int_to_ptr.hbm [resolvable:$true] %s2568_s29 }
 0x299   : > { %v1026_v56 = vpop.xlane.xlu0 %1025  ;;  %s2570_s4 = scalar_lea.hbm %s2569_s29, 4  ;;  %p2575_p4 = scmp.lt.s32.totalorder %s2569_s29, %s4019_s3 }
 0x29a   : > { %2436 = vrcp.f32 %v1026_v56  ;;  %v1029_v46 = vpop.xlane.xlu1 %1028  ;;  %p2571_p0 = scmp.ne.s32.totalorder %s2569_s29, %s2570_s4  ;;  %p2576_p5 = scmp.lt.s32.totalorder %s2574_s7, %s2570_s4 }
 0x29b   : > { %v2433_v35 = vpop.eup %2432  ;;  %2438 = vrcp.f32 %v1029_v46 }
 0x29c   : > { %v1067_v41 = vmul.f32 %v2433_v35, %v3077_v11  ;;  %v1005_v42 = vpop.xlane.xlu2 %1004  ;;  %v2435_v16 = vpop.eup %2434  ;;  %p2572_p1 = pnand %p2571_p0, %p2728_p3  ;;  %p2577_p6 = por %p2576_p5, %p2575_p4 }
 0x29d   : > { %2440 = vrcp.f32 %v1005_v42  ;;  %v1064_v12 = vmul.f32 %v2435_v16, %v3059_v1 }
 0x29e   : > { %v1083_v17 = vpack.c.bf16 %v1067_v41, %v1067_v41  ;;  %2442 = vrcp.f32 %v1014_v26  ;;  %p2573_p2 = pneg %p2572_p1 }
 0x29f   : > { %v1080_v60 = vpack.c.bf16 %v1064_v12, %v1064_v12 }
 0x2a0   : > { %v2437_v3 = vpop.eup %2436  ;;  %v1103_v6 = vunpack.c.l.b16 %v1083_v17  ;;  %p2578_p7 = pnand %p2577_p6, %p2573_p2 }
 0x2a1   : > { %v2439_v21 = vpop.eup %2438  ;;  %v1041_v38 = vpop.xlane.xlu0 %1040  ;;  %v1072_v9 = vmul.f32 %v2437_v3, %v3087_v36  ;;  %v1100_v53 = vunpack.c.l.b16 %v1080_v60 }
 0x2a2   : > { %v1020_v37 = vpop.xlane.xlu1 %1019  ;;  %v1105_v23 = vpack.c.b16 %v1103_v6, %v1102_v49  ;;  %v1073_v0 = vmul.f32 %v2439_v21, %v3098_v45 }
 0x2a3   : > { %v1088_v11 = vpack.c.bf16 %v1072_v9, %v1072_v9  ;;  %v2441_v44 = vpop.eup %2440 }
 0x2a4   : > { %2281 = vmatmul.msk.bf16.vlgmr.msra.gmra.mxu2 %vm999_vm15, %v1105_v23  ;;  %v1089_v63 = vpack.c.bf16 %v1073_v0, %v1073_v0  ;;  %v1017_v15 = vpop.xlane.xlu2 %1016  ;;  %v1065_v31 = vmul.f32 %v2441_v44, %v3108_v51  ;;  %v2443_v50 = vpop.eup %2442 }
 0x2a5   : > { %2444 = vrcp.f32 %v1017_v15  ;;  %v1177_v43 = vunpack.c.l.b16 %v1088_v11  ;;  %v1068_v14 = vmul.f32 %v2443_v50, %v3062_v2 }
 0x2a6   : > { %v1178_v28 = vunpack.c.l.b16 %v1089_v63  ;;  %v1081_v36 = vpack.c.bf16 %v1065_v31, %v1065_v31  ;;  %2446 = vrcp.f32 %v1041_v38 }
 0x2a7   : > { %v1084_v47 = vpack.c.bf16 %v1068_v14, %v1068_v14 }
 0x2a8   : > { %v1181_v7 = vpack.c.b16 %v1178_v28, %v1177_v43  ;;  %v1101_v45 = vunpack.c.l.b16 %v1081_v36 }
 0x2a9   : > { %v1032_v1 = vpop.xlane.xlu0 %1031  ;;  %v1139_v56 = vunpack.c.l.b16 %v1084_v47 }
 0x2aa   : > { %2448 = vrcp.f32 %v1032_v1  ;;  %2284 = vmatmul.msk.bf16.vlgmr.msra.gmra.mxu3 %vm999_vm15, %v1181_v7  ;;  %v1035_v24 = vpop.xlane.xlu1 %1034  ;;  %v1104_v51 = vpack.c.b16 %v1101_v45, %v1100_v53 }
 0x2ab   : > { %2450 = vrcp.f32 %v1035_v24  ;;  %v2445_v39 = vpop.eup %2444 }
 0x2ac   : > { %v1069_v40 = vmul.f32 %v2445_v39, %v3133_v22  ;;  %2280 = vmatmul.msk.bf16.vlgmr.msra.gmra.mxu1 %vm999_vm15, %v1104_v51  ;;  %v1038_v29 = vpop.xlane.xlu2 %1037  ;;  %v2447_v48 = vpop.eup %2446 }
 0x2ad   : > { %2452 = vrcp.f32 %v1038_v29  ;;  %v1077_v22 = vmul.f32 %v2447_v48, %v3116_v4 }
 0x2ae   : > { %v1085_v26 = vpack.c.bf16 %v1069_v40, %v1069_v40  ;;  %2454 = vrcp.f32 %v1020_v37 }
 0x2af   : > { %v1093_v17 = vpack.c.bf16 %v1077_v22, %v1077_v22 }
 0x2b0   : > { %v2449_v2 = vpop.eup %2448  ;;  %v1140_v54 = vunpack.c.l.b16 %v1085_v26 }
 0x2b1   : > { %v2451_v52 = vpop.eup %2450  ;;  %v1074_v55 = vmul.f32 %v2449_v2, %v3140_v8  ;;  %v1047_v3 = vpop.xlane.xlu0 %1046  ;;  %v1216_v38 = vunpack.c.l.b16 %v1093_v17 }
 0x2b2   : > { %v1075_v57 = vmul.f32 %v2451_v52, %v3144_v10  ;;  %v1143_v5 = vpack.c.b16 %v1140_v54, %v1139_v56 }
 0x2b3   : > { %v2453_v46 = vpop.eup %2452  ;;  %v1090_v35 = vpack.c.bf16 %v1074_v55, %v1074_v55 }
 0x2b4   : > { %v1091_v41 = vpack.c.bf16 %v1075_v57, %v1075_v57  ;;  %v1076_v59 = vmul.f32 %v2453_v46, %v3155_v25  ;;  %v1023_v42 = vpop.xlane.xlu2 %1022  ;;  %v2455_v16 = vpop.eup %2454  ;;  %2282 = vmatmul.msk.bf16.vlgmr.msrb.gmra.mxu2 %vm999_vm15, %v1143_v5 }
 0x2b5   : > { %2456 = vrcp.f32 %v1023_v42  ;;  %v1179_v49 = vunpack.c.l.b16 %v1090_v35  ;;  %v1070_v10 = vmul.f32 %v2455_v16, %v3121_v58 }
 0x2b6   : > { %v1180_v8 = vunpack.c.l.b16 %v1091_v41  ;;  %v1092_v6 = vpack.c.bf16 %v1076_v59, %v1076_v59  ;;  %2458 = vrcp.f32 %v1047_v3 }
 0x2b7   : > { %v1086_v23 = vpack.c.bf16 %v1070_v10, %v1070_v10 }
 0x2b8   : > { %v1182_v21 = vpack.c.b16 %v1180_v8, %v1179_v49  ;;  %v1215_v4 = vunpack.c.l.b16 %v1092_v6 }
 0x2b9   : > { %v1141_v44 = vunpack.c.l.b16 %v1086_v23 }
 0x2ba   : > { %2285 = vmatmul.msk.bf16.gmra.mxu3 %vm999_vm15, %v1182_v21  ;;  %v1219_v25 = vpack.c.b16 %v1216_v38, %v1215_v4 }
 0x2bb   : > { %v2457_v9 = vpop.eup %2456 }
 0x2bc   : > { %v1044_v12 = vpop.xlane.xlu2 %1043  ;;  %v1071_v37 = vmul.f32 %v2457_v9, %v3176_v33  ;;  %2286 = vmatmul.msk.bf16.vlgmr.msrb.gmra.mxu1 %vm999_vm15, %v1219_v25  ;;  %v2459_v0 = vpop.eup %2458 }
 0x2bd   : > { %2460 = vrcp.f32 %v1044_v12  ;;  %v1079_v15 = vmul.f32 %v2459_v0, %v3160_v62 }
 0x2be   : > { %v1087_v11 = vpack.c.bf16 %v1071_v37, %v1071_v37 }
 0x2bf   : > { %v1095_v43 = vpack.c.bf16 %v1079_v15, %v1079_v15 }
 0x2c0   : > { %v1142_v63 = vunpack.c.l.b16 %v1087_v11 }
 0x2c1   : > { %v1218_v33 = vunpack.c.l.b16 %v1095_v43 }
 0x2c2   : > { %v1144_v31 = vpack.c.b16 %v1142_v63, %v1141_v44 }
 0x2c3   : > { %v2461_v58 = vpop.eup %2460 }
 0x2c4   : > { %v1078_v60 = vmul.f32 %v2461_v58, %v3187_v61  ;;  %2283 = vmatmul.msk.bf16.gmra.mxu2 %vm999_vm15, %v1144_v31 }
 0x2c6   : > { %v1094_v28 = vpack.c.bf16 %v1078_v60, %v1078_v60 }
 0x2c8   : > { %v1217_v50 = vunpack.c.l.b16 %v1094_v28 }
 0x2ca   : > { %v1220_v36 = vpack.c.b16 %v1218_v33, %v1217_v50 }
 0x2cc   : > { %2287 = vmatmul.msk.bf16.gmra.mxu1 %vm999_vm15, %v1220_v36 }
 0x327   : > { %v1130_v34 = vpop.f32.mrf.mxu2 }
 0x328   : > { %v1255_v57 = vmul.f32 %v3166_v13, %v1130_v34  ;;  %v1319_v49 = vmul.f32 %v1130_v34, %v1130_v34 }
 0x329   : > { %v1125_v7 = vpop.f32.mrf.mxu1 }
 0x32a   : > { %v1253_v1 = vmul.f32 %v3171_v27, %v1125_v7  ;;  %v1317_v53 = vmul.f32 %v1125_v7, %v1125_v7  ;;  %v1275_v41 = vsel %vm318_vm0, %v1255_v57, 0.0  ;;  %v1339_v10 = vsel %vm318_vm0, %v1319_v49, 0.0  ;;  %v3289_v57 = vpop.xlane.xlu0 %1584 }
 0x32c   : > { %v1333_v62 = vsel %vm318_vm0, %v1317_v53, 0.0  ;;  %v1269_v14 = vsel %vm318_vm0, %v1253_v1, 0.0 }
 0x32d   : > { %v3230_v45 = vpop.f32.mrf.mxu3  ;;  %1334 = vadd.xlane.f32.xlu0 %v1333_v62  ;;  %1270 = vadd.xlane.f32.xlu1 %v1269_v14 }
 0x32e   : > { %v1261_v61 = vmul.f32 %v3171_v27, %v3230_v45 }
 0x32f   : > { %v1132_v59 = vpop.f32.mrf.mxu2 }
 0x330   : > { %v1293_v40 = vsel %vm318_vm0, %v1261_v61, 0.0  ;;  %v1256_v25 = vmul.f32 %v3149_v18, %v1132_v59  ;;  %v1320_v50 = vmul.f32 %v1132_v59, %v1132_v59 }
 0x331   : > { %v1127_v24 = vpop.f32.mrf.mxu1 }
 0x332   : > { %v1254_v51 = vmul.f32 %v3190_v20, %v1127_v24  ;;  %v1318_v48 = vmul.f32 %v1127_v24, %v1127_v24  ;;  %v1278_v23 = vsel %vm318_vm0, %v1256_v25, 0.0  ;;  %v1342_v1 = vsel %vm318_vm0, %v1320_v50, 0.0 }
 0x334   : > { %v1272_v29 = vsel %vm318_vm0, %v1254_v51, 0.0  ;;  %v1336_v54 = vsel %vm318_vm0, %v1318_v48, 0.0 }
 0x335   : > { %v1203_v39 = vpop.f32.mrf.mxu3  ;;  %1294 = vadd.xlane.f32.xlu0 %v1293_v40  ;;  %1273 = vadd.xlane.f32.xlu2 %v1272_v29 }
 0x336   : > { %v1262_v47 = vmul.f32 %v3190_v20, %v1203_v39  ;;  %v1326_v2 = vmul.f32 %v1203_v39, %v1203_v39 }
 0x337   : > { %v1163_v4 = vpop.f32.mrf.mxu2 }
 0x338   : > { %v1296_v32 = vsel %vm318_vm0, %v1262_v47, 0.0  ;;  %v1360_v56 = vsel %vm318_vm0, %v1326_v2, 0.0  ;;  %v1321_v63 = vmul.f32 %v1163_v4, %v1163_v4  ;;  %v1257_v14 = vmul.f32 %v3171_v27, %v1163_v4 }
 0x339   : > { %1297 = vadd.xlane.f32.xlu1 %v1296_v32  ;;  %v3241_v26 = vpop.f32.mrf.mxu1  ;;  %v1325_v2 = vmul.f32 %v3230_v45, %v3230_v45  ;;  %v3291_v45 = vpop.xlane.xlu2 %1581 }
 0x33a   : > { %v1265_v46 = vmul.f32 %v3171_v27, %v3241_v26  ;;  %v1345_v58 = vsel %vm318_vm0, %v1321_v63, 0.0  ;;  %v1281_v51 = vsel %vm318_vm0, %v1257_v14, 0.0  ;;  %v1329_v34 = vmul.f32 %v3241_v26, %v3241_v26 }
 0x33b   : > { %vm1608_vm6 = vcmp.eq.f32.partialorder %v3291_v45, inf  ;;  %vm1610_vm7 = vcmp.eq.f32.partialorder %v3291_v45, 0.0 }
 0x33c   : > { %v1305_v17 = vsel %vm318_vm0, %v1265_v46, 0.0 }
 0x33d   : > { %v1206_v52 = vpop.f32.mrf.mxu3  ;;  %1337 = vadd.xlane.f32.xlu0 %v1336_v54 }
 0x33e   : > { %v1263_v55 = vmul.f32 %v3166_v13, %v1206_v52  ;;  %v1327_v5 = vmul.f32 %v1206_v52, %v1206_v52  ;;  %v1369_v52 = vsel %vm318_vm0, %v1329_v34, 0.0 }
 0x33f   : > { %v1165_v44 = vpop.f32.mrf.mxu2 }
 0x340   : > { %v1299_v22 = vsel %vm318_vm0, %v1263_v55, 0.0  ;;  %v1363_v16 = vsel %vm318_vm0, %v1327_v5, 0.0  ;;  %v1258_v43 = vmul.f32 %v3190_v20, %v1165_v44  ;;  %v1322_v29 = vmul.f32 %v1165_v44, %v1165_v44  ;;  %v3286_v55 = vpop.xlane.xlu1 %1587 }
 0x341   : > { %1361 = vadd.xlane.f32.xlu1 %v1360_v56  ;;  %1300 = vadd.xlane.f32.xlu2 %v1299_v22  ;;  %v1241_v35 = vpop.f32.mrf.mxu1 }
 0x342   : > { %v1266_v8 = vmul.f32 %v3190_v20, %v1241_v35  ;;  %v1330_v12 = vmul.f32 %v1241_v35, %v1241_v35  ;;  %v1284_v7 = vsel %vm318_vm0, %v1258_v43, 0.0  ;;  %v1348_v27 = vsel %vm318_vm0, %v1322_v29, 0.0 }
 0x344   : > { %v1308_v38 = vsel %vm318_vm0, %v1266_v8, 0.0  ;;  %v1372_v0 = vsel %vm318_vm0, %v1330_v12, 0.0 }
 0x345   : > { %v1208_v42 = vpop.f32.mrf.mxu3  ;;  %1276 = vadd.xlane.f32.xlu0 %v1275_v41 }
 0x346   : > { %v1264_v3 = vmul.f32 %v3149_v18, %v1208_v42  ;;  %v1328_v15 = vmul.f32 %v1208_v42, %v1208_v42 }
 0x347   : > { %v1168_v33 = vpop.f32.mrf.mxu2 }
 0x348   : > { %v1302_v6 = vsel %vm318_vm0, %v1264_v3, 0.0  ;;  %v1366_v60 = vsel %vm318_vm0, %v1328_v15, 0.0  ;;  %v1323_v62 = vmul.f32 %v1168_v33, %v1168_v33  ;;  %v1259_v47 = vmul.f32 %v3166_v13, %v1168_v33  ;;  %v1579_v22 = vpop.xlane.xlu1 %1578 }
 0x349   : > { %1364 = vadd.xlane.f32.xlu2 %v1363_v16  ;;  %1306 = vadd.xlane.f32.xlu1 %v1305_v17  ;;  %v1244_v21 = vpop.f32.mrf.mxu1  ;;  %2462 = vrsqrt.f32 %v1579_v22  ;;  %vm1598_vm3 = vcmp.eq.f32.partialorder %v1579_v22, 0.0 }
 0x34a   : > { %v1267_v9 = vmul.f32 %v3166_v13, %v1244_v21  ;;  %v1331_v11 = vmul.f32 %v1244_v21, %v1244_v21  ;;  %v1351_v61 = vsel %vm318_vm0, %v1323_v62, 0.0  ;;  %v1287_v48 = vsel %vm318_vm0, %v1259_v47, 0.0 }
 0x34b   : > { %v1357_v13 = vsel %vm318_vm0, %v1325_v2, 0.0  ;;  %2464 = vrsqrt.f32 %v3291_v45 }
 0x34c   : > { %v1311_v37 = vsel %vm318_vm0, %v1267_v9, 0.0  ;;  %v1375_v31 = vsel %vm318_vm0, %v1331_v11, 0.0 }
 0x34d   : > { %1303 = vadd.xlane.f32.xlu0 %v1302_v6 }
 0x34f   : > { %v1170_v24 = vpop.f32.mrf.mxu2  ;;  %v2463_v26 = vpop.eup %2462 }
 0x350   : > { %v1324_v40 = vmul.f32 %v1170_v24, %v1170_v24  ;;  %v1260_v54 = vmul.f32 %v3149_v18, %v1170_v24  ;;  %v1590_v46 = vmul.f32 %v2463_v26, %v1579_v22 }
 0x351   : > { %1340 = vadd.xlane.f32.xlu1 %v1339_v10  ;;  %1309 = vadd.xlane.f32.xlu2 %v1308_v38  ;;  %v1246_v28 = vpop.f32.mrf.mxu1 }
 0x352   : > { %v1268_v36 = vmul.f32 %v3149_v18, %v1246_v28  ;;  %v1332_v20 = vmul.f32 %v1246_v28, %v1246_v28  ;;  %v1354_v32 = vsel %vm318_vm0, %v1324_v40, 0.0  ;;  %v1290_v56 = vsel %vm318_vm0, %v1260_v54, 0.0  ;;  %v2465_v18 = vpop.eup %2464 }
 0x353   : > { %v1591_v5 = vmul.f32 %v2463_v26, %v1590_v46  ;;  %v1602_v16 = vmul.f32 %v2465_v18, %v3291_v45 }
 0x354   : > { %v1314_v53 = vsel %vm318_vm0, %v1268_v36, 0.0  ;;  %v1378_v39 = vsel %vm318_vm0, %v1332_v20, 0.0  ;;  %vm1596_vm0 = vcmp.eq.f32.partialorder %v1579_v22, inf }
 0x355   : > { %1312 = vadd.xlane.f32.xlu0 %v1311_v37  ;;  %v1592_v41 = vmul.f32 0.5, %v1591_v5  ;;  %v1603_v6 = vmul.f32 %v2465_v18, %v1602_v16  ;;  %v2551_v5 = vld [vmem:[%s2755_s8 + $0x8] sm:$0xff] }
 0x357   : > { %v1593_v42 = vsub.f32 1.5, %v1592_v41  ;;  %v1604_v25 = vmul.f32 0.5, %v1603_v6 }
 0x359   : > { %1279 = vadd.xlane.f32.xlu1 %v1278_v23  ;;  %1373 = vadd.xlane.f32.xlu2 %v1372_v0  ;;  %v1594_v8 = vmul.f32 %v2463_v26, %v1593_v42  ;;  %v1605_v44 = vsub.f32 1.5, %v1604_v25 }
 0x35b   : > { %v1595_v9 = vmul.f32 %v1594_v8, %v1579_v22 }
 0x35d   : > { %1376 = vadd.xlane.f32.xlu0 %v1375_v31  ;;  %v1597_v11 = vsel %vm1596_vm0, %v1579_v22, %v1595_v9  ;;  %v1599_v31 = vand.u32 2147483648, %v1579_v22  ;;  %vm1632_vm0 = vcmp.eq.f32.partialorder %v3286_v55, inf }
 0x35f   : > { %v3319_v33 = vsel %vm1598_vm3, %v1599_v31, %v1597_v11 }
 0x361   : > { %1346 = vadd.xlane.f32.xlu1 %v1345_v58  ;;  %1367 = vadd.xlane.f32.xlu2 %v1366_v60 }
 0x365   : > { %1285 = vadd.xlane.f32.xlu0 %v1284_v7  ;;  %v1606_v7 = vmul.f32 %v2465_v18, %v1605_v44 }
 0x369   : > { %1343 = vadd.xlane.f32.xlu2 %v1342_v1  ;;  %1315 = vadd.xlane.f32.xlu1 %v1314_v53 }
 0x36d   : > { %1352 = vadd.xlane.f32.xlu0 %v1351_v61 }
 0x371   : > { %1282 = vadd.xlane.f32.xlu2 %v1281_v51  ;;  %1379 = vadd.xlane.f32.xlu1 %v1378_v39  ;;  %v1607_v39 = vmul.f32 %v1606_v7, %v3291_v45 }
 0x375   : > { %1355 = vadd.xlane.f32.xlu0 %v1354_v32 }
 0x379   : > { %1349 = vadd.xlane.f32.xlu2 %v1348_v27  ;;  %1288 = vadd.xlane.f32.xlu1 %v1287_v48 }
 0x37d   : > { %1370 = vadd.xlane.f32.xlu0 %v1369_v52  ;;  %v1609_v52 = vsel %vm1608_vm6, %v3291_v45, %v1607_v39  ;;  %vm1622_vm6 = vcmp.eq.f32.partialorder %v3289_v57, 0.0 }
 0x381   : > { %1358 = vadd.xlane.f32.xlu2 %v1357_v13  ;;  %v2550_v13 = vld [vmem:[%s2755_s8 + $0x10] sm:$0xff] }
 0x382   : > { %v3345_v54 = vsel %vm2038_vm5, %v2550_v13, 0.0 }
 0x389   : > { %1291 = vadd.xlane.f32.xlu2 %v1290_v56  ;;  %v1611_v56 = vand.u32 2147483648, %v3291_v45 }
 0x38b   : > { %v3354_v16 = vsel %vm1610_vm7, %v1611_v56, %v1609_v52 }
 0x3a0   : > { %v1335_v35 = vpop.xlane.xlu0 %1334  ;;  %v3294_v59 = vpop.xlane.xlu1 %1270 }
 0x3a1   : > { %2466 = vrsqrt.f32 %v1335_v35  ;;  %vm1388_vm2 = vcmp.eq.f32.partialorder %v1335_v35, inf  ;;  %v1391_v58 = vand.u32 2147483648, %v1335_v35  ;;  %vm1390_vm4 = vcmp.eq.f32.partialorder %v1335_v35, 0.0 }
 0x3a2   : > { %2468 = vrsqrt.f32 %v3286_v55 }
 0x3a3   : > { %2470 = vrsqrt.f32 %v3289_v57 }
 0x3a7   : > { %v2467_v17 = vpop.eup %2466 }
 0x3a8   : > { %v1382_v3 = vmul.f32 %v2467_v17, %v1335_v35  ;;  %v3297_v49 = vpop.xlane.xlu0 %1294  ;;  %v3300_v4 = vpop.xlane.xlu2 %1273 }
 0x3a9   : > { %v3305_v37 = vpop.eup %2468 }
 0x3aa   : > { %v1383_v21 = vmul.f32 %v2467_v17, %v1382_v3  ;;  %v1626_v15 = vmul.f32 %v3305_v37, %v3286_v55  ;;  %v3317_v50 = vpop.eup %2470 }
 0x3ab   : > { %v1614_v14 = vmul.f32 %v3317_v50, %v3289_v57 }
 0x3ac   : > { %v3302_v10 = vpop.xlane.xlu1 %1297  ;;  %v1384_v38 = vmul.f32 0.5, %v1383_v21  ;;  %v1627_v62 = vmul.f32 %v3305_v37, %v1626_v15 }
 0x3ad   : > { %v1615_v48 = vmul.f32 %v3317_v50, %v1614_v14 }
 0x3ae   : > { %v1385_v12 = vsub.f32 1.5, %v1384_v38  ;;  %v3337_v27 = vmul.f32 0.5, %v1627_v62 }
 0x3af   : > { %v1616_v18 = vmul.f32 0.5, %v1615_v48  ;;  %v2054_v48 = vrot.slane %v3345_v54, 4 }
 0x3b0   : > { %v1386_v23 = vmul.f32 %v2467_v17, %v1385_v12  ;;  %v3307_v0 = vpop.xlane.xlu0 %1337  ;;  %v1629_v41 = vsub.f32 1.5, %v3337_v27 }
 0x3b1   : > { %2472 = vrsqrt.f32 %v3307_v0  ;;  %vm1400_vm8 = vcmp.eq.f32.partialorder %v3307_v0, inf  ;;  %vm1402_vm9 = vcmp.eq.f32.partialorder %v3307_v0, 0.0  ;;  %v1403_v21 = vand.u32 2147483648, %v3307_v0 }
 0x3b2   : > { %v1387_v63 = vmul.f32 %v1386_v23, %v1335_v35  ;;  %v1617_v14 = vsub.f32 1.5, %v1616_v18  ;;  %v3403_v18 = vadd.f32 %v2054_v48, %v3345_v54 }
 0x3b4   : > { %v3312_v60 = vpop.xlane.xlu1 %1361  ;;  %v3314_v43 = vpop.xlane.xlu2 %1300  ;;  %v1389_v28 = vsel %vm1388_vm2, %v1335_v35, %v1387_v63  ;;  %v2046_v35 = vsel %vm2038_vm5, %v2551_v5, 0.0  ;;  %v1618_v5 = vmul.f32 %v3317_v50, %v1617_v14  ;;  %v2056_v54 = vrot.slane %v3403_v18, 2 }
 0x3b5   : > { %2474 = vrsqrt.f32 %v3312_v60  ;;  %v1392_v36 = vsel %vm1390_vm4, %v1391_v58, %v1389_v28  ;;  %vm1496_vm10 = vcmp.eq.f32.partialorder %v3312_v60, inf  ;;  %vm1498_vm13 = vcmp.eq.f32.partialorder %v3312_v60, 0.0 }
 0x3b6   : > { %v1637_v1 = vmul.f32 %v3319_v33, %v1392_v36  ;;  %v1499_v36 = vand.u32 2147483648, %v3312_v60  ;;  %v1619_v50 = vmul.f32 %v1618_v5, %v3289_v57  ;;  %vm1620_vm2 = vcmp.eq.f32.partialorder %v3289_v57, inf }
 0x3b7   : > { %v2473_v53 = vpop.eup %2472  ;;  %vm1634_vm4 = vcmp.eq.f32.partialorder %v3286_v55, 0.0 }
 0x3b8   : > { %v3325_v20 = vmax.f32 %v1637_v1, 1e-08  ;;  %v1394_v61 = vmul.f32 %v2473_v53, %v3307_v0  ;;  %v3328_v24 = vpop.xlane.xlu0 %1276 }
 0x3ba   : > { %2476 = vrcp.f32 %v3325_v20  ;;  %v1395_v40 = vmul.f32 %v2473_v53, %v1394_v61  ;;  %v1678_v11 = vand.u32 2147483647, %v3325_v20  ;;  %v1680_v44 = vand.u32 2147483648, %v3325_v20 }
 0x3bb   : > { %v2475_v51 = vpop.eup %2474  ;;  %vm1674_vm12 = vweird.f32 %v3325_v20 }
 0x3bc   : > { %v1490_v29 = vmul.f32 %v2475_v51, %v3312_v60  ;;  %v3333_v47 = vpop.xlane.xlu1 %1306  ;;  %v3335_v32 = vpop.xlane.xlu2 %1364  ;;  %v1396_v34 = vmul.f32 0.5, %v1395_v40  ;;  %vm1679_vm1 = vcmp.eq.f32.partialorder %v1678_v11, 8.507059e+37 }
 0x3bd   : > { %2478 = vrsqrt.f32 %v3335_v32  ;;  %vm1508_vm3 = vcmp.eq.f32.partialorder %v3335_v32, inf  ;;  %vm1510_vm7 = vcmp.eq.f32.partialorder %v3335_v32, 0.0 }
 0x3be   : > { %v1491_v2 = vmul.f32 %v2475_v51, %v1490_v29  ;;  %v1397_v22 = vsub.f32 1.5, %v1396_v34 }
 0x3c0   : > { %v1492_v26 = vmul.f32 0.5, %v1491_v2  ;;  %v2477_v46 = vpop.eup %2476  ;;  %v3352_v42 = vpop.xlane.xlu0 %1303  ;;  %v1398_v3 = vmul.f32 %v2473_v53, %v1397_v22  ;;  %v1630_v22 = vmul.f32 %v3305_v37, %v1629_v41 }
 0x3c1   : > { %v1670_v17 = vmul.f32 %v2477_v46, %v3325_v20  ;;  %vm1675_vm11 = vweird.f32 %v2477_v46  ;;  %v1681_v20 = vor.u32 1.1754944e-38, %v1680_v44  ;;  %v1635_v44 = vand.u32 2147483648, %v3286_v55 }
 0x3c2   : > { %v1493_v8 = vsub.f32 1.5, %v1492_v26  ;;  %v1399_v45 = vmul.f32 %v1398_v3, %v3307_v0  ;;  %vm1676_vm15 = vmor %vm1674_vm12, %vm1675_vm11 }
 0x3c3   : > { %v2479_v6 = vpop.eup %2478  ;;  %v1671_v38 = vsub.f32 1.0, %v1670_v17  ;;  %v1631_v17 = vmul.f32 %v1630_v22, %v3286_v55 }
 0x3c4   : > { %v1494_v9 = vmul.f32 %v2475_v51, %v1493_v8  ;;  %v1502_v25 = vmul.f32 %v2479_v6, %v3335_v32  ;;  %v3363_v12 = vpop.xlane.xlu1 %1340  ;;  %v3365_v23 = vpop.xlane.xlu2 %1309  ;;  %v1401_v15 = vsel %vm1400_vm8, %v3307_v0, %v1399_v45 }
 0x3c5   : > { %2480 = vrsqrt.f32 %v3363_v12  ;;  %v1672_v63 = vmul.f32 %v2477_v46, %v1671_v38  ;;  %v1404_v28 = vsel %vm1402_vm9, %v1403_v21, %v1401_v15  ;;  %v1511_v15 = vand.u32 2147483648, %v3335_v32 }
 0x3c6   : > { %v1495_v31 = vmul.f32 %v1494_v9, %v3312_v60  ;;  %v1503_v58 = vmul.f32 %v2479_v6, %v1502_v25  ;;  %v1638_v1 = vmul.f32 %v3354_v16, %v1404_v28  ;;  %v1633_v9 = vsel %vm1632_vm0, %v3286_v55, %v1631_v17 }
 0x3c7   : > { %v1673_v7 = vadd.f32 %v2477_v46, %v1672_v63  ;;  %v1621_v63 = vsel %vm1620_vm2, %v3289_v57, %v1619_v50  ;;  %v3444_v28 = vsel %vm1634_vm4, %v1635_v44, %v1633_v9 }
 0x3c8   : > { %v1497_v53 = vsel %vm1496_vm10, %v3312_v60, %v1495_v31  ;;  %v1504_v62 = vmul.f32 0.5, %v1503_v58  ;;  %v3382_v0 = vpop.xlane.xlu0 %1312  ;;  %v3384_v39 = vmax.f32 %v1638_v1, 1e-08  ;;  %v2047_v60 = vrot.slane %v2046_v35, 4 }
 0x3c9   : > { %v1500_v61 = vsel %vm1498_vm13, %v1499_v36, %v1497_v53  ;;  %v1677_v51 = vsel %vm1676_vm15, %v2477_v46, %v1673_v7  ;;  %v1623_v31 = vand.u32 2147483648, %v3289_v57  ;;  %v1415_v57 = vand.u32 2147483648, %v3363_v12 }
 0x3ca   : > { %v1646_v40 = vmul.f32 %v3354_v16, %v1500_v61  ;;  %v1505_v29 = vsub.f32 1.5, %v1504_v62  ;;  %v1682_v34 = vsel %vm1679_vm1, %v1681_v20, %v1677_v51  ;;  %2482 = vrcp.f32 %v3384_v39 }
 0x3cb   : > { %v3387_v27 = vpop.eup %2480  ;;  %v1683_v2 = vmul.f32 %v1682_v34, %v3294_v59  ;;  %v3405_v59 = vadd.f32 %v2047_v60, %v2046_v35  ;;  %v3450_v53 = vsel %vm1622_vm6, %v1623_v31, %v1621_v63  ;;  %vm1689_vm8 = vweird.f32 %v3384_v39 }
 0x3cc   : > { %v3392_v52 = vmax.f32 %v1646_v40, 1e-08  ;;  %v3394_v13 = vpop.xlane.xlu1 %1279  ;;  %v3396_v56 = vpop.xlane.xlu2 %1373  ;;  %v1506_v26 = vmul.f32 %v2479_v6, %v1505_v29  ;;  %v1406_v46 = vmul.f32 %v3387_v27, %v3363_v12  ;;  %v1695_v61 = vand.u32 2147483648, %v3384_v39 }
 0x3cd   : > { %1926 = vperm.xlu1 %2404, %v1683_v2   ;;  %v2049_v35 = vrot.slane %v3405_v59, 2  ;;  %v1693_v60 = vand.u32 2147483647, %v3384_v39  ;;  %vm1412_vm10 = vcmp.eq.f32.partialorder %v3363_v12, inf  ;;  %vm1414_vm13 = vcmp.eq.f32.partialorder %v3363_v12, 0.0 }
 0x3ce   : > { %2484 = vrcp.f32 %v3392_v52  ;;  %v1507_v3 = vmul.f32 %v1506_v26, %v3335_v32  ;;  %v1407_v37 = vmul.f32 %v3387_v27, %v1406_v46  ;;  %vm1809_vm11 = vweird.f32 %v3392_v52 }
 0x3cf   : > { %v1696_v9 = vor.u32 1.1754944e-38, %v1695_v61  ;;  %vm1694_vm15 = vcmp.eq.f32.partialorder %v1693_v60, 8.507059e+37 }
 0x3d0   : > { %v3411_v41 = vpop.xlane.xlu0 %1376  ;;  %v3413_v8 = vpop.eup %2482  ;;  %v1509_v25 = vsel %vm1508_vm3, %v3335_v32, %v1507_v3  ;;  %v1408_v11 = vmul.f32 0.5, %v1407_v37  ;;  %v1813_v37 = vand.u32 2147483647, %v3392_v52 }
 0x3d1   : > { %2486 = vrsqrt.f32 %v3411_v41  ;;  %v1685_v38 = vmul.f32 %v3413_v8, %v3384_v39  ;;  %v1512_v36 = vsel %vm1510_vm7, %v1511_v15, %v1509_v25  ;;  %vm1690_vm9 = vweird.f32 %v3413_v8 }
 0x3d2   : > { %2488 = vrsqrt.f32 %v3396_v56  ;;  %v1409_v62 = vsub.f32 1.5, %v1408_v11  ;;  %v1647_v29 = vmul.f32 %v3450_v53, %v1512_v36  ;;  %vm1691_vm12 = vmor %vm1689_vm8, %vm1690_vm9  ;;  %v1815_v25 = vand.u32 2147483648, %v3392_v52 }
 0x3d3   : > { %v1686_v7 = vsub.f32 1.0, %v1685_v38  ;;  %vm3498_vm0 = vcmp.eq.f32.partialorder %v1813_v37, 8.507059e+37  ;;  %vm1556_vm4 = vcmp.eq.f32.partialorder %v3411_v41, inf  ;;  %vm1558_vm8 = vcmp.eq.f32.partialorder %v3411_v41, 0.0 }
 0x3d4   : > { %v3423_v6 = vpop.xlane.xlu1 %1346  ;;  %v3425_v21 = vpop.xlane.xlu2 %1367  ;;  %v1410_v17 = vmul.f32 %v3387_v27, %v1409_v62  ;;  %v3484_v11 = vmax.f32 %v1647_v29, 1e-08 }
 0x3d5   : > { %v3429_v45 = vpop.eup %2484  ;;  %2490 = vrsqrt.f32 %v3423_v6  ;;  %v1687_v20 = vmul.f32 %v3413_v8, %v1686_v7  ;;  %vm1436_vm3 = vcmp.eq.f32.partialorder %v3423_v6, inf  ;;  %vm1438_vm6 = vcmp.eq.f32.partialorder %v3423_v6, 0.0 }
 0x3d6   : > { %2492 = vrsqrt.f32 %v3425_v21  ;;  %v1805_v55 = vmul.f32 %v3429_v45, %v3392_v52  ;;  %v1411_v7 = vmul.f32 %v1410_v17, %v3363_v12  ;;  %vm1810_vm1 = vweird.f32 %v3429_v45 }
 0x3d7   : > { %v3442_v58 = vpop.eup %2486  ;;  %v1688_v46 = vadd.f32 %v3413_v8, %v1687_v20  ;;  %vm3507_vm2 = vmor %vm1809_vm11, %vm1810_vm1  ;;  %v1439_v37 = vand.u32 2147483648, %v3423_v6  ;;  %vm1520_vm7 = vcmp.eq.f32.partialorder %v3425_v21, inf  ;;  %vm1522_vm9 = vcmp.eq.f32.partialorder %v3425_v21, 0.0 }
 0x3d8   : > { %v3448_v1 = vpop.eup %2488  ;;  %v1550_v32 = vmul.f32 %v3442_v58, %v3411_v41  ;;  %v3455_v14 = vpop.xlane.xlu0 %1285  ;;  %v1806_v51 = vsub.f32 1.0, %v1805_v55 }
 0x3d9   : > { %v1538_v34 = vmul.f32 %v3448_v1, %v3396_v56  ;;  %v1692_v44 = vsel %vm1691_vm12, %v3413_v8, %v1688_v46 }
 0x3da   : > { %v1551_v48 = vmul.f32 %v3442_v58, %v1550_v32  ;;  %v1807_v3 = vmul.f32 %v3429_v45, %v1806_v51  ;;  %v1697_v36 = vsel %vm1694_vm15, %v1696_v9, %v1692_v44  ;;  %v1559_v32 = vand.u32 2147483648, %v3411_v41 }
 0x3db   : > { %v2491_v40 = vpop.eup %2490  ;;  %v1539_v63 = vmul.f32 %v3448_v1, %v1538_v34  ;;  %v1698_v39 = vmul.f32 %v1697_v36, %v3300_v4  ;;  %v1816_v4 = vor.u32 1.1754944e-38, %v1815_v25 }
 0x3dc   : > { %v1430_v2 = vmul.f32 %v2491_v40, %v3423_v6  ;;  %v3468_v22 = vpop.xlane.xlu1 %1315  ;;  %v3470_v26 = vpop.xlane.xlu2 %1343  ;;  %v1552_v27 = vmul.f32 0.5, %v1551_v48  ;;  %v1808_v62 = vadd.f32 %v3429_v45, %v1807_v3  ;;  %v1413_v3 = vsel %vm1412_vm10, %v3363_v12, %v1411_v7 }
 0x3dd   : > { %v2493_v5 = vpop.eup %2492  ;;  %2494 = vrsqrt.f32 %v3470_v26  ;;  %1938 = vperm.xlu1 %2404, %v1698_v39   ;;  %v1540_v48 = vmul.f32 0.5, %v1539_v63  ;;  %v1416_v44 = vsel %vm1414_vm13, %v1415_v57, %v1413_v3  ;;  %vm1824_vm10 = vweird.f32 %v3484_v11 }
 0x3de   : > { %v1431_v50 = vmul.f32 %v2491_v40, %v1430_v2  ;;  %v1514_v38 = vmul.f32 %v2493_v5, %v3425_v21  ;;  %v1553_v51 = vsub.f32 1.5, %v1552_v27  ;;  %vm1424_vm12 = vcmp.eq.f32.partialorder %v3470_v26, inf }
 0x3df   : > { %v1541_v63 = vsub.f32 1.5, %v1540_v48 }
 0x3e0   : > { %v1432_v15 = vmul.f32 0.5, %v1431_v50  ;;  %v1515_v31 = vmul.f32 %v2493_v5, %v1514_v38  ;;  %v3491_v55 = vpop.xlane.xlu0 %1352  ;;  %v1554_v9 = vmul.f32 %v3442_v58, %v1553_v51 }
 0x3e1   : > { %2496 = vrsqrt.f32 %v3491_v55  ;;  %v1542_v29 = vmul.f32 %v3448_v1, %v1541_v63  ;;  %vm1460_vm13 = vcmp.eq.f32.partialorder %v3491_v55, inf  ;;  %vm1462_vm1 = vcmp.eq.f32.partialorder %v3491_v55, 0.0 }
 0x3e2   : > { %v1433_v20 = vsub.f32 1.5, %v1432_v15  ;;  %v1516_v8 = vmul.f32 0.5, %v1515_v31  ;;  %2498 = vrcp.f32 %v3484_v11  ;;  %v3629_v1 = vadd.f32 %v2049_v35, %v3405_v59 }
 0x3e3   : > { %v2495_v61 = vpop.eup %2494  ;;  %v1547_v35 = vand.u32 2147483648, %v3396_v56 }
 0x3e4   : > { %v1434_v60 = vmul.f32 %v2491_v40, %v1433_v20  ;;  %v1517_v34 = vsub.f32 1.5, %v1516_v8  ;;  %v1418_v2 = vmul.f32 %v2495_v61, %v3470_v26  ;;  %v3511_v17 = vpop.xlane.xlu1 %1379  ;;  %v1812_v40 = vsel %vm3507_vm2, %v3429_v45, %v1808_v62  ;;  %v3525_v38 = vpop.xlane.xlu2 %1282 }
 0x3e5   : > { %2500 = vrsqrt.f32 %v3511_v17  ;;  %v1817_v45 = vsel %vm3498_vm0, %v1816_v4, %v1812_v40  ;;  %v1639_v62 = vmul.f32 %v3450_v53, %v1416_v44  ;;  %v1555_v20 = vmul.f32 %v1554_v9, %v3411_v41 }
 0x3e6   : > { %v1435_v52 = vmul.f32 %v1434_v60, %v3423_v6  ;;  %v1518_v50 = vmul.f32 %v2493_v5, %v1517_v34  ;;  %v1419_v25 = vmul.f32 %v2495_v61, %v1418_v2  ;;  %v1818_v15 = vmul.f32 %v1817_v45, %v3302_v10 }
 0x3e7   : > { %v2497_v27 = vpop.eup %2496  ;;  %v1828_v10 = vand.u32 2147483647, %v3484_v11  ;;  %v1523_v4 = vand.u32 2147483648, %v3425_v21  ;;  %vm1426_vm2 = vcmp.eq.f32.partialorder %v3470_v26, 0.0 }
 0x3e8   : > { %v1437_v5 = vsel %vm1436_vm3, %v3423_v6, %v1435_v52  ;;  %v3539_v58 = vpop.eup %2498  ;;  %v1420_v36 = vmul.f32 0.5, %v1419_v25  ;;  %v1454_v7 = vmul.f32 %v2497_v27, %v3491_v55  ;;  %v3544_v39 = vpop.xlane.xlu0 %1355  ;;  %v1519_v12 = vmul.f32 %v1518_v50, %v3425_v21  ;;  %1944 = vperm.xlu2 %2405, %v1818_v15  }
 0x3e9   : > { %v1440_v31 = vsel %vm1438_vm6, %v1439_v37, %v1437_v5  ;;  %2502 = vrsqrt.f32 %v3544_v39  ;;  %v1820_v46 = vmul.f32 %v3539_v58, %v3484_v11  ;;  %vm3563_vm11 = vcmp.eq.f32.partialorder %v1828_v10, 8.507059e+37 }
 0x3ea   : > { %v1641_v57 = vmul.f32 %v3319_v33, %v1440_v31  ;;  %v1421_v8 = vsub.f32 1.5, %v1420_v36  ;;  %v1455_v51 = vmul.f32 %v2497_v27, %v1454_v7  ;;  %v1521_v3 = vsel %vm1520_vm7, %v3425_v21, %v1519_v12 }
 0x3eb   : > { %v2501_v6 = vpop.eup %2500  ;;  %v1830_v52 = vand.u32 2147483648, %v3484_v11  ;;  %v3568_v37 = vmax.f32 %v1639_v62, 1e-08  ;;  %v1543_v25 = vmul.f32 %v1542_v29, %v3396_v56  ;;  %v1821_v44 = vsub.f32 1.0, %v1820_v46 }
 0x3ec   : > { %v1562_v48 = vmul.f32 %v2501_v6, %v3511_v17  ;;  %v3555_v60 = vmax.f32 %v1641_v57, 1e-08  ;;  %v1422_v34 = vmul.f32 %v2495_v61, %v1421_v8  ;;  %v1456_v2 = vmul.f32 0.5, %v1455_v51  ;;  %v3578_v63 = vpop.xlane.xlu2 %1349 }
 0x3ed   : > { %v1557_v61 = vsel %vm1556_vm4, %v3411_v41, %v1555_v20  ;;  %v1524_v5 = vsel %vm1522_vm9, %v1523_v4, %v1521_v3  ;;  %v1822_v12 = vmul.f32 %v3539_v58, %v1821_v44  ;;  %vm1825_vm15 = vweird.f32 %v3539_v58 }
 0x3ee   : > { %v1563_v40 = vmul.f32 %v2501_v6, %v1562_v48  ;;  %v1457_v50 = vsub.f32 1.5, %v1456_v2  ;;  %2504 = vrcp.f32 %v3555_v60  ;;  %v1423_v15 = vmul.f32 %v1422_v34, %v3470_v26  ;;  %vm1826_vm0 = vmor %vm1824_vm10, %vm1825_vm15 }
 0x3ef   : > { %v3574_v9 = vpop.eup %2502  ;;  %v1560_v36 = vsel %vm1558_vm8, %v1559_v32, %v1557_v61  ;;  %2506 = vrsqrt.f32 %v3578_v63  ;;  %v1463_v10 = vand.u32 2147483648, %v3491_v55  ;;  %v1823_v32 = vadd.f32 %v3539_v58, %v1822_v12 }
 0x3f0   : > { %v1564_v45 = vmul.f32 0.5, %v1563_v40  ;;  %v1458_v31 = vmul.f32 %v2497_v27, %v1457_v50  ;;  %v1466_v21 = vmul.f32 %v3574_v9, %v3544_v39  ;;  %v1648_v27 = vmul.f32 %v3444_v28, %v1524_v5  ;;  %v3615_v2 = vpop.xlane.xlu0 %1370 }
 0x3f1   : > { %v1651_v62 = vmul.f32 %v3450_v53, %v1560_v36  ;;  %v1425_v20 = vsel %vm1424_vm12, %v3470_v26, %v1423_v15  ;;  %v1831_v51 = vor.u32 1.1754944e-38, %v1830_v52  ;;  %v1827_v48 = vsel %vm1826_vm0, %v3539_v58, %v1823_v32 }
 0x3f2   : > { %v1565_v7 = vsub.f32 1.5, %v1564_v45  ;;  %v1459_v57 = vmul.f32 %v1458_v31, %v3491_v55  ;;  %2508 = vrcp.f32 %v3568_v37  ;;  %v1467_v34 = vmul.f32 %v3574_v9, %v1466_v21 }
 0x3f3   : > { %v3617_v46 = vmax.f32 %v1648_v27, 1e-08  ;;  %v3624_v58 = vadd.f32 %v2056_v54, %v3403_v18  ;;  %vm1544_vm3 = vcmp.eq.f32.partialorder %v3396_v56, inf  ;;  %2510 = vrsqrt.f32 %v3615_v2 }
 0x3f4   : > { %v1566_v41 = vmul.f32 %v2501_v6, %v1565_v7  ;;  %v1461_v8 = vsel %vm1460_vm13, %v3491_v55, %v1459_v57  ;;  %v3605_v29 = vpop.eup %2504  ;;  %v1427_v6 = vand.u32 2147483648, %v3470_v26  ;;  %v1832_v55 = vsel %vm3563_vm11, %v1831_v51, %v1827_v48  ;;  %v3656_v7 = vpop.xlane.xlu2 %1358 }
 0x3f5   : > { %v1464_v4 = vsel %vm1462_vm1, %v1463_v10, %v1461_v8  ;;  %v1833_v26 = vmul.f32 %v1832_v55, %v3314_v43  ;;  %v2507_v52 = vpop.eup %2506  ;;  %v1730_v61 = vmul.f32 %v3605_v29, %v3555_v60  ;;  %v1545_v18 = vsel %vm1544_vm3, %v3396_v56, %v1543_v25 }
 0x3f6   : > { %v1643_v11 = vmul.f32 %v3450_v53, %v1464_v4  ;;  %v1428_v3 = vsel %vm1426_vm2, %v1427_v6, %v1425_v20  ;;  %v1567_v40 = vmul.f32 %v1566_v41, %v3511_v17  ;;  %v3631_v53 = vmax.f32 %v1651_v62, 1e-08 }
 0x3f7   : > { %1956 = vperm.xlu1 %2404, %v1833_v26   ;;  %v1442_v50 = vmul.f32 %v2507_v52, %v3578_v63  ;;  %v1640_v54 = vmul.f32 %v3444_v28, %v1428_v3  ;;  %vm1568_vm4 = vcmp.eq.f32.partialorder %v3511_v17, inf  ;;  %v1468_v59 = vmul.f32 0.5, %v1467_v34 }
 0x3f8   : > { %v3636_v43 = vmax.f32 %v1643_v11, 1e-08  ;;  %2512 = vrcp.f32 %v3617_v46  ;;  %v1569_v45 = vsel %vm1568_vm4, %v3511_v17, %v1567_v40  ;;  %v3646_v5 = vpop.eup %2508  ;;  %vm1546_vm6 = vcmp.eq.f32.partialorder %v3396_v56, 0.0 }
 0x3f9   : > { %v1443_v44 = vmul.f32 %v2507_v52, %v1442_v50  ;;  %2514 = vrcp.f32 %v3631_v53  ;;  %v1571_v25 = vand.u32 2147483648, %v3511_v17  ;;  %v1731_v15 = vsub.f32 1.0, %v1730_v61  ;;  %v2511_v27 = vpop.eup %2510 }
 0x3fa   : > { %v3651_v31 = vsel %vm1546_vm6, %v1547_v35, %v1545_v18  ;;  %vm1570_vm7 = vcmp.eq.f32.partialorder %v3511_v17, 0.0  ;;  %v1740_v36 = vand.u32 2147483648, %v3555_v60  ;;  %2516 = vrcp.f32 %v3636_v43 }
 0x3fb   : > { %v3658_v12 = vmax.f32 %v1640_v54, 1e-08  ;;  %v1572_v57 = vsel %vm1570_vm7, %v1571_v25, %v1569_v45  ;;  %v1469_v21 = vsub.f32 1.5, %v1468_v59  ;;  %v1444_v56 = vmul.f32 0.5, %v1443_v44 }
 0x3fc   : > { %vm1734_vm8 = vweird.f32 %v3555_v60  ;;  %v1738_v10 = vand.u32 2147483647, %v3555_v60  ;;  %v1475_v41 = vand.u32 2147483648, %v3544_v39  ;;  %v1700_v17 = vmul.f32 %v3646_v5, %v3568_v37 }
 0x3fd   : > { %v1732_v32 = vmul.f32 %v3605_v29, %v1731_v15  ;;  %v1445_v62 = vsub.f32 1.5, %v1444_v56  ;;  %v1526_v20 = vmul.f32 %v2511_v27, %v3615_v2  ;;  %2518 = vrsqrt.f32 %v3656_v7 }
 0x3fe   : > { %v3668_v8 = vpop.eup %2512  ;;  %v1652_v51 = vmul.f32 %v3444_v28, %v1572_v57  ;;  %vm1735_vm9 = vweird.f32 %v3605_v29  ;;  %v3672_v6 = vor.u32 1.1754944e-38, %v1740_v36  ;;  %v1701_v4 = vsub.f32 1.0, %v1700_v17 }
 0x3ff   : > { %v3674_v48 = vpop.eup %2514  ;;  %2520 = vrcp.f32 %v3658_v12  ;;  %v1470_v34 = vmul.f32 %v3574_v9, %v1469_v21  ;;  %v1527_v55 = vmul.f32 %v2511_v27, %v1526_v20  ;;  %v1710_v11 = vand.u32 2147483648, %v3568_v37  ;;  %vm3709_vm2 = vmor %vm1734_vm8, %vm1735_vm9 }
 0x400   : > { %v3679_v3 = vpop.eup %2516  ;;  %vm1472_vm10 = vcmp.eq.f32.partialorder %v3544_v39, inf  ;;  %vm1448_vm11 = vcmp.eq.f32.partialorder %v3578_v63, inf  ;;  %v1451_v40 = vand.u32 2147483648, %v3578_v63  ;;  %v1702_v26 = vmul.f32 %v3646_v5, %v1701_v4 }
 0x401   : > { %vm1705_vm12 = vweird.f32 %v3646_v5  ;;  %v1708_v61 = vand.u32 2147483647, %v3568_v37  ;;  %v3688_v50 = vadd.f32 %v3605_v29, %v1732_v32  ;;  %v1446_v9 = vmul.f32 %v2507_v52, %v1445_v62 }
 0x402   : > { %v1528_v18 = vmul.f32 0.5, %v1527_v55  ;;  %v1835_v54 = vmul.f32 %v3668_v8, %v3617_v46  ;;  %v3692_v59 = vmax.f32 %v1652_v51, 1e-08  ;;  %v1768_v35 = vand.u32 2147483647, %v3636_v43 }
 0x403   : > { %v1703_v45 = vadd.f32 %v3646_v5, %v1702_v26  ;;  %vm1704_vm13 = vweird.f32 %v3568_v37  ;;  %v2519_v44 = vpop.eup %2518  ;;  %v1471_v25 = vmul.f32 %v1470_v34, %v3544_v39  ;;  %v1760_v15 = vmul.f32 %v3679_v3, %v3636_v43 }
 0x404   : > { %v1529_v36 = vsub.f32 1.5, %v1528_v18  ;;  %vm1706_vm15 = vmor %vm1704_vm13, %vm1705_vm12  ;;  %v1711_v52 = vor.u32 1.1754944e-38, %v1710_v11  ;;  %vm1450_vm1 = vcmp.eq.f32.partialorder %v3578_v63, 0.0  ;;  %vm1709_vm0 = vcmp.eq.f32.partialorder %v1708_v61, 8.507059e+37 }
 0x405   : > { %v1707_v57 = vsel %vm1706_vm15, %v3646_v5, %v1703_v45  ;;  %v1478_v21 = vmul.f32 %v2519_v44, %v3656_v7  ;;  %v1836_v56 = vsub.f32 1.0, %v1835_v54  ;;  %v3703_v17 = vpop.eup %2520  ;;  %v1770_v32 = vand.u32 2147483648, %v3636_v43 }
 0x406   : > { %v1447_v62 = vmul.f32 %v1446_v9, %v3578_v63  ;;  %v1530_v20 = vmul.f32 %v2511_v27, %v1529_v36  ;;  %v1712_v5 = vsel %vm1709_vm0, %v1711_v52, %v1707_v57  ;;  %v1737_v51 = vsel %vm3709_vm2, %v3605_v29, %v3688_v50 }
 0x407   : > { %vm1532_vm3 = vcmp.eq.f32.partialorder %v3615_v2, inf  ;;  %v1713_v4 = vmul.f32 %v1712_v5, %v3328_v24  ;;  %v1479_v34 = vmul.f32 %v2519_v44, %v1478_v21  ;;  %2522 = vrcp.f32 %v3692_v59 }
 0x408   : > { %v1531_v55 = vmul.f32 %v1530_v20, %v3615_v2  ;;  %vm1534_vm4 = vcmp.eq.f32.partialorder %v3615_v2, 0.0  ;;  %v1535_v11 = vand.u32 2147483648, %v3615_v2  ;;  %v1761_v27 = vsub.f32 1.0, %v1760_v15 }
 0x409   : > { %1950 = vperm.xlu2 %2405, %v1713_v4   ;;  %v1480_v26 = vmul.f32 0.5, %v1479_v34  ;;  %v1837_v61 = vmul.f32 %v3668_v8, %v1836_v56  ;;  %vm1840_vm6 = vweird.f32 %v3668_v8  ;;  %v1473_v24 = vsel %vm1472_vm10, %v3544_v39, %v1471_v25 }
 0x40a   : > { %v1449_v29 = vsel %vm1448_vm11, %v3578_v63, %v1447_v62  ;;  %v1533_v50 = vsel %vm1532_vm3, %v3615_v2, %v1531_v55  ;;  %vm1839_vm7 = vweird.f32 %v3617_v46  ;;  %vm3737_vm8 = vcmp.eq.f32.partialorder %v1738_v10, 8.507059e+37 }
 0x40b   : > { %v1536_v18 = vsel %vm1534_vm4, %v1535_v11, %v1533_v50  ;;  %v1481_v54 = vsub.f32 1.5, %v1480_v26  ;;  %v1838_v45 = vadd.f32 %v3668_v8, %v1837_v61  ;;  %v1843_v25 = vand.u32 2147483647, %v3617_v46  ;;  %vm3746_vm11 = vmor %vm1839_vm7, %vm1840_vm6 }
 0x40c   : > { %vm1474_vm9 = vcmp.eq.f32.partialorder %v3544_v39, 0.0  ;;  %v1649_v15 = vmul.f32 %v3319_v33, %v1536_v18  ;;  %vm1484_vm10 = vcmp.eq.f32.partialorder %v3656_v7, inf  ;;  %v1845_v60 = vand.u32 2147483648, %v3617_v46 }
 0x40d   : > { %v1715_v10 = vmul.f32 %v3703_v17, %v3658_v12  ;;  %v1762_v36 = vmul.f32 %v3679_v3, %v1761_v27  ;;  %vm1764_vm12 = vweird.f32 %v3636_v43  ;;  %v1482_v52 = vmul.f32 %v2519_v44, %v1481_v54  ;;  %v3759_v56 = vpop.eup %2522 }
 0x40e   : > { %v1487_v57 = vand.u32 2147483648, %v3656_v7  ;;  %v1842_v21 = vsel %vm3746_vm11, %v3668_v8, %v1838_v45  ;;  %v1452_v46 = vsel %vm1450_vm1, %v1451_v40, %v1449_v29  ;;  %v3765_v37 = vmax.f32 %v1649_v15, 1e-08 }
 0x40f   : > { %v1846_v62 = vor.u32 1.1754944e-38, %v1845_v60  ;;  %v1716_v20 = vsub.f32 1.0, %v1715_v10  ;;  %v1483_v5 = vmul.f32 %v1482_v52, %v3656_v7  ;;  %vm1844_vm13 = vcmp.eq.f32.partialorder %v1843_v25, 8.507059e+37 }
 0x410   : > { %vm1720_vm15 = vweird.f32 %v3703_v17  ;;  %v1723_v44 = vand.u32 2147483647, %v3658_v12  ;;  %2524 = vrcp.f32 %v3765_v37  ;;  %v1725_v34 = vand.u32 2147483648, %v3658_v12 }
 0x411   : > { %v1847_v8 = vsel %vm1844_vm13, %v1846_v62, %v1842_v21  ;;  %v1717_v4 = vmul.f32 %v3703_v17, %v1716_v20  ;;  %v1642_v63 = vmul.f32 %v3354_v16, %v1452_v46  ;;  %v1485_v40 = vsel %vm1484_vm10, %v3656_v7, %v1483_v5  ;;  %v1289_v20 = vpop.xlane.xlu1 %1288 }
 0x412   : > { %vm1486_vm1 = vcmp.eq.f32.partialorder %v3656_v7, 0.0  ;;  %v1848_v55 = vmul.f32 %v1847_v8, %v3352_v42  ;;  %vm1719_vm0 = vweird.f32 %v3658_v12  ;;  %v1880_v26 = vmul.f32 %v3674_v48, %v3631_v53 }
 0x413   : > { %v1488_v11 = vsel %vm1486_vm1, %v1487_v57, %v1485_v40  ;;  %v1718_v27 = vadd.f32 %v3703_v17, %v1717_v4  ;;  %v1763_v61 = vadd.f32 %v3679_v3, %v1762_v36  ;;  %vm1765_vm2 = vweird.f32 %v3679_v3  ;;  %vm1721_vm3 = vmor %vm1719_vm0, %vm1720_vm15 }
 0x414   : > { %v1645_v29 = vmul.f32 %v3319_v33, %v1488_v11  ;;  %1968 = vperm.xlu2 %2405, %v1848_v55   ;;  %v1726_v7 = vor.u32 1.1754944e-38, %v1725_v34  ;;  %v1742_v42 = vsel %vm3737_vm8, %v3672_v6, %v1737_v51  ;;  %vm1724_vm4 = vcmp.eq.f32.partialorder %v1723_v44, 8.507059e+37  ;;  %vm3802_vm6 = vmor %vm1764_vm12, %vm1765_vm2 }
 0x415   : > { %v1722_v12 = vsel %vm1721_vm3, %v3703_v17, %v1718_v27  ;;  %v1881_v50 = vsub.f32 1.0, %v1880_v26  ;;  %v1476_v18 = vsel %vm1474_vm9, %v1475_v41, %v1473_v24  ;;  %v3796_v54 = vmax.f32 %v1642_v63, 1e-08 }
 0x416   : > { %v3798_v33 = vmax.f32 %v1645_v29, 1e-08  ;;  %v1727_v45 = vsel %vm1724_vm4, %v1726_v7, %v1722_v12  ;;  %v2525_v25 = vpop.eup %2524  ;;  %vm3808_vm7 = vcmp.eq.f32.partialorder %v1768_v35, 8.507059e+37  ;;  %v1771_v39 = vor.u32 1.1754944e-38, %v1770_v32 }
 0x417   : > { %v1728_v41 = vmul.f32 %v1727_v45, %v3394_v13  ;;  %v1882_v17 = vmul.f32 %v3674_v48, %v1881_v50  ;;  %v1767_v51 = vsel %vm3802_vm6, %v3679_v3, %v1763_v61  ;;  %vm1885_vm8 = vweird.f32 %v3674_v48 }
 0x418   : > { %2526 = vrcp.f32 %v3798_v33  ;;  %v1850_v35 = vmul.f32 %v2525_v25, %v3765_v37  ;;  %v1743_v24 = vmul.f32 %v1742_v42, %v3525_v38  ;;  %v1644_v15 = vmul.f32 %v3444_v28, %v1476_v18 }
 0x419   : > { %1962 = vperm.xlu1 %2404, %v1728_v41   ;;  %v1883_v43 = vadd.f32 %v3674_v48, %v1882_v17  ;;  %v1890_v13 = vand.u32 2147483648, %v3631_v53  ;;  %2528 = vrcp.f32 %v3796_v54  ;;  %vm1884_vm9 = vweird.f32 %v3631_v53 }
 0x41a   : > { %v1888_v3 = vand.u32 2147483647, %v3631_v53  ;;  %v1851_v32 = vsub.f32 1.0, %v1850_v35  ;;  %v2058_v2 = vrot.slane %v3624_v58, 1  ;;  %v2051_v60 = vrot.slane %v3629_v1, 1  ;;  %vm3833_vm10 = vmor %vm1884_vm9, %vm1885_vm8 }
 0x41b   : > { %v1772_v38 = vsel %vm3808_vm7, %v1771_v39, %v1767_v51  ;;  %v1887_v10 = vsel %vm3833_vm10, %v3674_v48, %v1883_v43  ;;  %vm1855_vm11 = vweird.f32 %v2525_v25  ;;  %v1860_v53 = vand.u32 2147483648, %v3765_v37 }
 0x41c   : > { %1929 = vperm.xlu2 %2405, %v1743_v24   ;;  %v1852_v36 = vmul.f32 %v2525_v25, %v1851_v32  ;;  %v1650_v52 = vmul.f32 %v3354_v16, %v3651_v31  ;;  %v1891_v57 = vor.u32 1.1754944e-38, %v1890_v13  ;;  %v1858_v21 = vand.u32 2147483647, %v3765_v37 }
 0x41d   : > { %v1895_v46 = vmul.f32 %v3759_v56, %v3692_v59  ;;  %v3846_v5 = vmax.f32 %v1644_v15, 1e-08  ;;  %vm1889_vm12 = vcmp.eq.f32.partialorder %v1888_v3, 8.507059e+37  ;;  %vm1854_vm13 = vweird.f32 %v3765_v37 }
 0x41e   : > { %v2527_v62 = vpop.eup %2526  ;;  %v1853_v44 = vadd.f32 %v2525_v25, %v1852_v36  ;;  %v1773_v48 = vmul.f32 %v1772_v38, %v1289_v20  ;;  %v1892_v8 = vsel %vm1889_vm12, %v1891_v57, %v1887_v10  ;;  %vm3849_vm15 = vmor %vm1854_vm13, %vm1855_vm11  ;;  %v2059_v63 = vadd.f32 %v2058_v2, %v3624_v58 }
 0x41f   : > { %v1790_v16 = vmul.f32 %v2527_v62, %v3798_v33  ;;  %v1896_v31 = vsub.f32 1.0, %v1895_v46  ;;  %v3854_v34 = vpop.eup %2528  ;;  %v1861_v55 = vor.u32 1.1754944e-38, %v1860_v53  ;;  %v1798_v11 = vand.u32 2147483647, %v3798_v33 }
 0x420   : > { %v1857_v40 = vsel %vm3849_vm15, %v2525_v25, %v1853_v44  ;;  %vm1859_vm1 = vcmp.eq.f32.partialorder %v1858_v21, 8.507059e+37  ;;  %v1800_v27 = vand.u32 2147483648, %v3798_v33  ;;  %v3861_v26 = vmax.f32 %v1650_v52, 1e-08 }
 0x421   : > { %1953 = vperm.xlu1 %2404, %v1773_v48   ;;  %v1791_v37 = vsub.f32 1.0, %v1790_v16  ;;  %2530 = vrcp.f32 %v3846_v5  ;;  %v1893_v61 = vmul.f32 %v1892_v8, %v3382_v0  ;;  %v1862_v29 = vsel %vm1859_vm1, %v1861_v55, %v1857_v40  ;;  %v2553_v8 = vld [vmem:[%s2755_s8 + $0x18] sm:$0xff] }
 0x422   : > { %vm1795_vm0 = vweird.f32 %v2527_v62  ;;  %v1897_v58 = vmul.f32 %v3759_v56, %v1896_v31  ;;  %v1745_v42 = vmul.f32 %v3854_v34, %v3796_v54  ;;  %vm1794_vm2 = vweird.f32 %v3798_v33 }
 0x423   : > { %v1792_v7 = vmul.f32 %v2527_v62, %v1791_v37  ;;  %vm3869_vm3 = vcmp.eq.f32.partialorder %v1798_v11, 8.507059e+37  ;;  %vm2315_vm4 = vcmp.lt.s32.totalorder %v2059_v63, 0  ;;  %v2052_v50 = vadd.f32 %v2051_v60, %v3629_v1  ;;  %vm1796_vm6 = vmor %vm1794_vm2, %vm1795_vm0 }
 0x424   : > { %1959 = vperm.xlu2 %2405, %v1893_v61   ;;  %v1863_v0 = vmul.f32 %v1862_v29, %v3333_v47  ;;  %v1801_v45 = vor.u32 1.1754944e-38, %v1800_v27  ;;  %v2316_v25 = vceil.f32 %v2059_v63  ;;  %v2317_v9 = vfloor.f32 %v2059_v63 }
 0x425   : > { %v1793_v18 = vadd.f32 %v2527_v62, %v1792_v7  ;;  %vm1900_vm7 = vweird.f32 %v3759_v56  ;;  %vm2310_vm8 = vcmp.lt.s32.totalorder %v2052_v50, 0  ;;  %v2311_v6 = vceil.f32 %v2052_v50 }
 0x426   : > { %v1898_v33 = vadd.f32 %v3759_v56, %v1897_v58  ;;  %v1746_v41 = vsub.f32 1.0, %v1745_v42  ;;  %v2312_v17 = vfloor.f32 %v2052_v50  ;;  %v1905_v47 = vand.u32 2147483648, %v3692_v59  ;;  %v1292_v50 = vpop.xlane.xlu2 %1291 }
 0x427   : > { %v1797_v39 = vsel %vm1796_vm6, %v2527_v62, %v1793_v18  ;;  %v3877_v51 = vpop.eup %2530  ;;  %vm1899_vm9 = vweird.f32 %v3692_v59  ;;  %v1903_v24 = vand.u32 2147483647, %v3692_v59  ;;  %2532 = vrcp.f32 %v3861_v26  ;;  %v2552_v59 = vld [vmem:[%s2755_s8] sm:$0xff]  ;;  %s208_s8 = sand.u32 1, %s2624_s13  }
 0x428   : > { %v1802_v1 = vsel %vm3869_vm3, %v1801_v45, %v1797_v39  ;;  %v2313_v15 = vsel %vm2310_vm8, %v2311_v6, %v2312_v17  ;;  %v2318_v43 = vsel %vm2315_vm4, %v2316_v25, %v2317_v9  ;;  %vm1901_vm10 = vmor %vm1899_vm9, %vm1900_vm7  ;;  %v1775_v3 = vmul.f32 %v3877_v51, %v3846_v5  ;;  %s2263_s10 = sshll.u32 %s208_s8, 2  ;;  %s2145_s28 = scalar_lea.sflag [#allocation3], %s208_s8 }
 0x429   : > { %1935 = vperm.xlu1 %2404, %v1863_v0   ;;  %v1803_v35 = vmul.f32 %v1802_v1, %v3297_v49  ;;  %v2314_v13 = vcvt.f32.s32 %v2313_v15  ;;  %v1902_v32 = vsel %vm1901_vm10, %v3759_v56, %v1898_v33  ;;  %v1747_v49 = vmul.f32 %v3854_v34, %v1746_v41  ;;  %s210_s15 = scalar_lea.vmem [#allocation2], %s2263_s10 }
 0x42a   : > { %v1906_v2 = vor.u32 1.1754944e-38, %v1905_v47  ;;  %v2039_v60 = vsel %vm2038_vm5, %v2552_v59, 0.0  ;;  %v2319_v38 = vcvt.f32.s32 %v2318_v43  ;;  %vm1904_vm11 = vcmp.eq.f32.partialorder %v1903_v24, 8.507059e+37  ;;  %s2159_s24 = sshll.u32 %s210_s15, 4  ;;  %s2160_s24 = int_to_ptr.vmem [resolvable:$true] %s2159_s24 }
 0x42b   : > { %1932 = vperm.xlu0 %2403, %v1803_v35   ;;  %v1776_v10 = vsub.f32 1.0, %v1775_v3  ;;  %v1748_v36 = vadd.f32 %v3854_v34, %v1747_v49  ;;  %vm1750_vm12 = vweird.f32 %v3854_v34  ;;  %v2040_v52 = vrot.slane %v2039_v60, 4 }
 0x42c   : > { %2075 = vperm.xlu2 %2405, %v2314_v13   ;;  %v1907_v28 = vsel %vm1904_vm11, %v1906_v2, %v1902_v32  ;;  %v1755_v56 = vand.u32 2147483648, %v3796_v54  ;;  %vm1749_vm13 = vweird.f32 %v3796_v54  ;;  %v1753_v21 = vand.u32 2147483647, %v3796_v54 }
 0x42d   : > { %v2533_v53 = vpop.eup %2532  ;;  %v1908_v57 = vmul.f32 %v1907_v28, %v3468_v22  ;;  %vm1751_vm15 = vmor %vm1749_vm13, %vm1750_vm12  ;;  %v1777_v46 = vmul.f32 %v3877_v51, %v1776_v10  ;;  %v2041_v44 = vadd.f32 %v2040_v52, %v2039_v60  ;;  %v2060_v4 = vsel %vm2038_vm5, %v2553_v8, 0.0 }
 0x42e   : > { %v1752_v62 = vsel %vm1751_vm15, %v3854_v34, %v1748_v36  ;;  %v1865_v20 = vmul.f32 %v2533_v53, %v3861_v26  ;;  %v1756_v48 = vor.u32 1.1754944e-38, %v1755_v56  ;;  %vm1754_vm1 = vcmp.eq.f32.partialorder %v1753_v21, 8.507059e+37 }
 0x42f   : > { %v1778_v22 = vadd.f32 %v3877_v51, %v1777_v46  ;;  %vm1780_vm0 = vweird.f32 %v3877_v51  ;;  %v2042_v31 = vrot.slane %v2041_v44, 2  ;;  %v2061_v63 = vrot.slane %v2060_v4, 4 }
 0x430   : > { %v1757_v16 = vsel %vm1754_vm1, %v1756_v48, %v1752_v62  ;;  %v1866_v54 = vsub.f32 1.0, %v1865_v20  ;;  %v1785_v40 = vand.u32 2147483648, %v3846_v5  ;;  %vm1779_vm2 = vweird.f32 %v3846_v5 }
 0x431   : > { %2078 = vperm.xlu1 %2404, %v2319_v38   ;;  %v1783_v34 = vand.u32 2147483647, %v3846_v5  ;;  %v1758_v55 = vmul.f32 %v1757_v16, %v3455_v14  ;;  %vm1781_vm3 = vmor %vm1779_vm2, %vm1780_vm0  ;;  %v2043_v27 = vadd.f32 %v2042_v31, %v2041_v44  ;;  %v2062_v61 = vadd.f32 %v2061_v63, %v2060_v4 }
 0x432   : > { %v1782_v11 = vsel %vm1781_vm3, %v3877_v51, %v1778_v22  ;;  %v1867_v37 = vmul.f32 %v2533_v53, %v1866_v54  ;;  %v1786_v29 = vor.u32 1.1754944e-38, %v1785_v40  ;;  %vm1870_vm4 = vweird.f32 %v2533_v53 }
 0x433   : > { %1971 = vperm.xlu0 %2403, %v1908_v57   ;;  %vm1784_vm5 = vcmp.eq.f32.partialorder %v1783_v34, 8.507059e+37  ;;  %v2044_v42 = vrot.slane %v2043_v27, 1  ;;  %v2063_v12 = vrot.slane %v2062_v61, 2  ;;  %v1875_v0 = vand.u32 2147483648, %v3861_v26 }
 0x434   : > { %v1787_v7 = vsel %vm1784_vm5, %v1786_v29, %v1782_v11  ;;  %v1868_v58 = vadd.f32 %v2533_v53, %v1867_v37  ;;  %vm1869_vm6 = vweird.f32 %v3861_v26  ;;  %v1873_v14 = vand.u32 2147483647, %v3861_v26 }
 0x435   : > { %v1788_v5 = vmul.f32 %v1787_v7, %v1292_v50  ;;  %vm1871_vm7 = vmor %vm1869_vm6, %vm1870_vm4  ;;  %v2045_v45 = vadd.f32 %v2044_v42, %v2043_v27  ;;  %v2064_v25 = vadd.f32 %v2063_v12, %v2062_v61  ;;  %v1876_v9 = vor.u32 1.1754944e-38, %v1875_v0 }
 0x436   : > { %v1872_v18 = vsel %vm1871_vm7, %v2533_v53, %v1868_v58  ;;  %vm1874_vm8 = vcmp.eq.f32.partialorder %v1873_v14, 8.507059e+37  ;;  %v1973_v38 = vlaneseq  ;;  %vm1991_vm11 = vcmask 1041409  }
 0x437   : > { %v1877_v6 = vsel %vm1874_vm8, %v1876_v9, %v1872_v18  ;;  %v2065_v39 = vrot.slane %v2064_v25, 1  ;;  %v2306_v33 = vceil.f32 %v2045_v45  ;;  %v2307_v41 = vfloor.f32 %v2045_v45 }
 0x438   : > { %v1878_v17 = vmul.f32 %v1877_v6, %v3365_v23  ;;  %vm2305_vm9 = vcmp.lt.s32.totalorder %v2045_v45, 0  ;;  %v3917_v36 = vand.u32 127, %v1973_v38  ;;  %vm1993_vm12 = vcmask 1042434  }
 0x439   : > { %v2308_v51 = vsel %vm2305_vm9, %v2306_v33, %v2307_v41  ;;  %v2066_v1 = vadd.f32 %v2065_v39, %v2064_v25  ;;  %vm1995_vm13 = vcmask 1043459   ;;  %vm2105_vm15 = vcmask 60416  }
 0x43a   : > { %v2309_v47 = vcvt.f32.s32 %v2308_v51 }
 0x43b   : > { %1941 = vperm.xlu0 %2403, %v1758_v55   ;;  %v2321_v35 = vceil.f32 %v2066_v1  ;;  %v2322_v26 = vfloor.f32 %v2066_v1  ;;  %vm2320_vm10 = vcmp.lt.s32.totalorder %v2066_v1, 0 }
 0x43d   : > { %v2323_v24 = vsel %vm2320_vm10, %v2321_v35, %v2322_v26 }
 0x43e   : > { %v2324_v15 = vcvt.f32.s32 %v2323_v24 }
 0x43f   : > { %v1927_v43 = vpop.permute.xlu1 %1926 }
 0x440   : > { %v1975_v44 = vperm.slane %v1927_v43, %v3917_v36 }
 0x442   : > { %v1945_v13 = vpop.permute.xlu2 %1944 }
 0x443   : > { %1965 = vperm.xlu0 %2403, %v1788_v5   ;;  %v1981_v0 = vperm.slane %v1945_v13, %v3917_v36 }
 0x44b   : > { %1947 = vperm.xlu0 %2403, %v1878_v17  }
 0x44f   : > { %v1939_v3 = vpop.permute.xlu1 %1938 }
 0x450   : > { %v1979_v7 = vperm.slane %v1939_v3, %v3917_v36 }
 0x453   : > { %2072 = vperm.xlu0 %2403, %v2309_v47  }
 0x45b   : > { %2081 = vperm.xlu0 %2403, %v2324_v15  }
 0x463   : > { %v1951_v32 = vpop.permute.xlu2 %1950 }
 0x464   : > { %v1983_v56 = vperm.slane %v1951_v32, %v3917_v36 }
 0x469   : > { %v1957_v49 = vpop.permute.xlu1 %1956 }
 0x46a   : > { %v1985_v46 = vperm.slane %v1957_v49, %v3917_v36 }
 0x46e   : > { %v1969_v2 = vpop.permute.xlu2 %1968 }
 0x46f   : > { %v1989_v55 = vperm.slane %v1969_v2, %v3917_v36 }
 0x476   : > { %v1930_v28 = vpop.permute.xlu2 %1929 }
 0x477   : > { %v1976_v57 = vperm.slane %v1930_v28, %v3917_v36 }
 0x479   : > { %v1992_v4 = vsel %vm1991_vm11, %v1976_v57, %v1975_v44 }
 0x47e   : > { %v1960_v62 = vpop.permute.xlu2 %1959 }
 0x47f   : > { %v1986_v16 = vperm.slane %v1960_v62, %v3917_v36 }
 0x486   : > { %v2076_v15 = vpop.permute.xlu2 %2075 }
 0x48b   : > { %v1963_v23 = vpop.permute.xlu1 %1962 }
 0x48c   : > { %v1987_v31 = vperm.slane %v1963_v23, %v3917_v36 }
 0x493   : > { %v1954_v10 = vpop.permute.xlu1 %1953 }
 0x494   : > { %v1984_v53 = vperm.slane %v1954_v10, %v3917_v36 }
 0x496   : > { %v2000_v21 = vsel %vm1991_vm11, %v1984_v53, %v1983_v56 }
 0x497   : > { %v2001_v48 = vsel %vm1993_vm12, %v1985_v46, %v2000_v21 }
 0x498   : > { %v2002_v63 = vsel %vm1995_vm13, %v1986_v16, %v2001_v48 }
 0x499   : > { %v2010_v61 = vrot.slane %v2002_v63, 4 }
 0x49b   : > { %v1936_v8 = vpop.permute.xlu1 %1935 }
 0x49c   : > { %v1978_v40 = vperm.slane %v1936_v8, %v3917_v36 }
 0x49d   : > { %v1933_v59 = vpop.permute.xlu0 %1932 }
 0x49e   : > { %v1977_v20 = vperm.slane %v1933_v59, %v3917_v36 }
 0x4a0   : > { %v1994_v22 = vsel %vm1993_vm12, %v1977_v20, %v1992_v4 }
 0x4a1   : > { %v1996_v11 = vsel %vm1995_vm13, %v1978_v40, %v1994_v22 }
 0x4a2   : > { %v2011_v42 = vsel %vm559_vm14, %v2010_v61, %v1996_v11 }
 0x4a3   : > { %v2015_v14 = vperm.slane %v2011_v42, %v2841_v19  ;;  %v2079_v23 = vpop.permute.xlu1 %2078 }
 0x4a5   : > { %v1972_v60 = vpop.permute.xlu0 %1971  ;;  %v2024_v39 = vrot.slane %v2015_v14, 4 }
 0x4a6   : > { %v1990_v58 = vperm.slane %v1972_v60, %v3917_v36 }
 0x4ad   : > { %v1942_v52 = vpop.permute.xlu0 %1941 }
 0x4ae   : > { %v1980_v37 = vperm.slane %v1942_v52, %v3917_v36 }
 0x4b0   : > { %v1997_v12 = vsel %vm1991_vm11, %v1980_v37, %v1979_v7 }
 0x4b1   : > { %v1998_v25 = vsel %vm1993_vm12, %v1981_v0, %v1997_v12 }
 0x4b5   : > { %v1966_v54 = vpop.permute.xlu0 %1965 }
 0x4b6   : > { %v1988_v34 = vperm.slane %v1966_v54, %v3917_v36 }
 0x4b8   : > { %v2003_v27 = vsel %vm1991_vm11, %v1988_v34, %v1987_v31 }
 0x4b9   : > { %v2004_v29 = vsel %vm1993_vm12, %v1989_v55, %v2003_v27 }
 0x4ba   : > { %v2005_v50 = vsel %vm1995_vm13, %v1990_v58, %v2004_v29 }
 0x4bb   : > { %v2016_v45 = vrot.slane %v2005_v50, 4 }
 0x4bd   : > { %v1948_v5 = vpop.permute.xlu0 %1947 }
 0x4be   : > { %v1982_v18 = vperm.slane %v1948_v5, %v3917_v36 }
 0x4c0   : > { %v1999_v9 = vsel %vm1995_vm13, %v1982_v18, %v1998_v25 }
 0x4c1   : > { %v2017_v6 = vsel %vm559_vm14, %v2016_v45, %v1999_v9 }
 0x4c2   : > { %v2021_v33 = vperm.slane %v2017_v6, %v2841_v19 }
 0x4c4   : > { %v2022_v41 = vrot.slane %v2021_v33, 4  ;;  %v2025_v17 = vsel %vm559_vm14, %v2021_v33, %v2024_v39 }
 0x4c5   : > { %v2073_v51 = vpop.permute.xlu0 %2072  ;;  %v2033_v1 = vperm.slane %v2025_v17, %v2847_v30 }
 0x4c6   : > { %v2023_v47 = vsel %vm559_vm14, %v2022_v41, %v2015_v14  ;;  %v2083_v19 = vsel %vm1991_vm11, %v2076_v15, %v2073_v51 }
 0x4c7   : > { %v2089_v35 = vmul.f32 6.0, %v2033_v1  ;;  %v2029_v26 = vperm.slane %v2023_v47, %v2847_v30  ;;  %v2036_v24 = vrot.slane %v2033_v1, 4  ;;  %v2084_v28 = vsel %vm1993_vm12, %v2079_v23, %v2083_v19 }
 0x4c9   : > { %v2095_v43 = vmul.f32 1.442695, %v2089_v35  ;;  %v2087_v13 = vmul.f32 6.0, %v2029_v26  ;;  %v2034_v3 = vrot.slane %v2029_v26, 4  ;;  %v2037_v32 = vsel %vm559_vm14, 0.0, %v2036_v24 }
 0x4ca   : > { %v2090_v49 = vmul.f32 6.0, %v2037_v32 }
 0x4cb   : > { %2534 = vpow2.f32 %v2095_v43  ;;  %v2091_v2 = vmul.f32 1.442695, %v2087_v13  ;;  %v2035_v59 = vsel %vm559_vm14, 0.0, %v2034_v3  ;;  %vm2142_vm14 = vcmask 27648  }
 0x4cc   : > { %v2088_v60 = vmul.f32 6.0, %v2035_v59  ;;  %v2097_v30 = vmul.f32 1.442695, %v2090_v49 }
 0x4cd   : > { %v2082_v38 = vpop.permute.xlu0 %2081  ;;  %2536 = vpow2.f32 %v2091_v2 }
 0x4ce   : > { %v2085_v10 = vsel %vm1995_vm13, %v2082_v38, %v2084_v28  ;;  %v2093_v53 = vmul.f32 1.442695, %v2088_v60 }
 0x4cf   : > { %vm2086_vm1 = vcmp.lt.s32.totalorder %v3917_v36, %v2085_v10 }
 0x4d0   : > { %2538 = vpow2.f32 %v2093_v53 }
 0x4d1   : > { %v2535_v52 = vpop.eup %2534  ;;  %2540 = vpow2.f32 %v2097_v30 }
 0x4d2   : > { %v2103_v56 = vsel %vm2086_vm1, %v2535_v52, 0.0 }
 0x4d3   : > { %v2537_v57 = vpop.eup %2536  ;;  %v2112_v21 = vsel %vm2105_vm15, %v2103_v56, 0.0 }
 0x4d4   : > { %2113 = vadd.xlane.f32.xlu0 %v2112_v21  ;;  %v2101_v46 = vsel %vm2086_vm1, %v2537_v57, 0.0 }
 0x4d5   : > { %v2106_v62 = vsel %vm2105_vm15, %v2101_v46, 0.0 }
 0x4d6   : > { %v2539_v20 = vpop.eup %2538  ;;  %2107 = vadd.xlane.f32.xlu2 %v2106_v62 }
 0x4d7   : > { %v2541_v44 = vpop.eup %2540  ;;  %v2102_v48 = vsel %vm2086_vm1, %v2539_v20, 0.0 }
 0x4d8   : > { %v2109_v8 = vsel %vm2105_vm15, %v2102_v48, 0.0  ;;  %v2104_v4 = vsel %vm2086_vm1, %v2541_v44, 0.0 }
 0x4d9   : > { %2110 = vadd.xlane.f32.xlu1 %v2109_v8  ;;  %v2115_v16 = vsel %vm2105_vm15, %v2104_v4, 0.0 }
 0x4de   : > { %2116 = vadd.xlane.f32.xlu2 %v2115_v16 }
 0x547   : > { %v2114_v22 = vpop.xlane.xlu0 %2113 }
 0x549   : > { %v2108_v54 = vpop.xlane.xlu2 %2107 }
 0x54a   : > { %2542 = vlog2.f32 %v2108_v54 }
 0x54b   : > { %2544 = vlog2.f32 %v2114_v22 }
 0x54c   : > { %v2111_v31 = vpop.xlane.xlu1 %2110 }
 0x54d   : > { %2546 = vlog2.f32 %v2111_v31 }
 0x550   : > { %v2543_v63 = vpop.eup %2542 }
 0x551   : > { %v2545_v40 = vpop.eup %2544  ;;  %v2119_v34 = vmul.f32 0.6931472, %v2543_v63  ;;  %v2117_v55 = vpop.xlane.xlu2 %2116 }
 0x552   : > { %2548 = vlog2.f32 %v2117_v55  ;;  %v2123_v37 = vmul.f32 0.6931472, %v2545_v40 }
 0x553   : > { %v2547_v11 = vpop.eup %2546  ;;  %v2126_v61 = vmul.f32 0.16666667, %v2119_v34 }
 0x554   : > { %v2121_v27 = vmul.f32 0.6931472, %v2547_v11  ;;  %v2128_v58 = vmul.f32 0.16666667, %v2123_v37 }
 0x555   : > { %v2134_v12 = vperm.slane %v2126_v61, %v3917_v36 }
 0x556   : > { %v2127_v29 = vmul.f32 0.16666667, %v2121_v27  ;;  %v2136_v14 = vperm.slane %v2128_v58, %v3917_v36 }
 0x558   : > { %v2549_v7 = vpop.eup %2548  ;;  %v2135_v42 = vperm.slane %v2127_v29, %v3917_v36 }
 0x559   : > { %v2125_v50 = vmul.f32 0.6931472, %v2549_v7 }
 0x55a   : > { %v2138_v0 = vsel %vm1991_vm11, %v2135_v42, %v2134_v12 }
 0x55b   : > { %v2129_v5 = vmul.f32 0.16666667, %v2125_v50  ;;  %v2139_v45 = vsel %vm1993_vm12, %v2136_v14, %v2138_v0 }
 0x55d   : > { %v2137_v18 = vperm.slane %v2129_v5, %v3917_v36 }
 0x55f   : > { %v2140_v25 = vsel %vm1995_vm13, %v2137_v18, %v2139_v45 }
 0x560   : > { %2143 = vst.msk [vmem:[%s210_s15] sm:$0xf] %vm2142_vm14, %v2140_v25 }
 0x561   : > { %2581 = shalt.err (!%p2578_p7)
}
 0x562   : > { %2325 = dma.vmem_to_hbm [thread:$0]  (%p2728_p3), %s2160_s24, 64, %s2162_s27, %s2145_s28  }
 0x563 PF: > { %p2331_p9 = scmp.ge.s32.totalorder %s2648_s19, 2  ;;  %s2173_s8 = sand.u32 1, %s2620_s12  }
 0x564   : > { %s2174_s11 = scalar_lea.sflag [#allocation3], %s2173_s8 }
 0x565   : > { %p2328_p10 = pnand %p2331_p9, %p2737_p8 }
 0x567   : > { %p2329_p11 = pneg %p2328_p10 }
 0x569   : > { %2615 = dma.done.wait (%p2329_p11), %s2174_s11, 64  }
 0x56a   : > { %2617 = vsyncadd (%p2329_p11), %s2174_s11, 4294967232  ;;  %s16_s19 = sadd.s32 1, %s2648_s19   ;;  %s4044_s12 = smov %s2624_s13 }
 0x56b   : > { %p13_p12 = scmp.ge.s32.totalorder %s16_s19, 6   ;;  %s4045_s13 = smov %s2628_s14 }
 0x56c   : > { %s4046_s14 = smov %s2746_s30  ;;  %s4047_s15 = smov %s2640_s17 }
 0x56d   : > { %s4048_s16 = smov %s2644_s18  ;;  %s4049_s17 = smov %s4052_s22 }
 0x56e   : > { %s4050_s18 = smov %s4056_s23  ;;  %15 = sbr.rel (!%p13_p12) target bundleno = 5 (0x5), region = 73 }
 0x573   :  { %2180 = vsyncpa [#allocation3], 1 }
 0x574   :  { %2182 = vsyncpa [#allocation3 + $0x1], 1 }

</bundles_post_ra>
